<compile_context>
chip_gen: v7x
topology: tpu7x:2x2x1
jax: 0.10.0
libtpu: 0.0.40
codegen_flags: <defaults>
</compile_context>

<pallas_src>
import jax
import jax.numpy as jnp
from jax.experimental import pallas as pl
from jax.experimental.pallas import tpu as pltpu


def _autoencoder_kernel(x_ref, w1_ref, b1_ref, w2_ref, b2_ref, o_ref):
    # Encoder: h = relu(x @ W1 + b1); matmul operands in the weights' dtype
    # (bf16), accumulation in f32 on the MXU.
    x = x_ref[...].astype(w1_ref.dtype)
    h = jnp.dot(x, w1_ref[...], preferred_element_type=jnp.float32)
    h = jnp.maximum(h + b1_ref[...], 0.0)          # bias/ReLU stay f32 (VPU)
    # Decoder: y = h @ W2 + b2
    y = jnp.dot(h.astype(w2_ref.dtype), w2_ref[...],
                preferred_element_type=jnp.float32)
    o_ref[...] = (y + b2_ref[...]).astype(o_ref.dtype)


def _device_kind():
    try:
        return jax.devices()[0].device_kind.lower()
    except Exception:
        return ""


def _vmem_capacity_bytes():
    """Physical VMEM per TensorCore (128 MiB on v5e/v6e, 64 MiB on v7x)."""
    try:
        cap = int(pltpu.get_tpu_info().vmem_capacity_bytes)
        if cap > 0:
            return cap
    except Exception:
        pass
    return (64 << 20) if "v7" in _device_kind() else (128 << 20)


def _num_tensorcores():
    """TensorCores sharing the grid via megacore sharding (2 on v7x)."""
    return 2 if "v7" in _device_kind() else 1


def _default_param_dtype():
    # bf16 everywhere, including v5e: the restriction there is bf16 VPU
    # arithmetic, not MXU inputs; all elementwise math in the kernel is f32.
    return jnp.bfloat16


def _per_row_vmem_bytes(D, H, x_isz, o_isz, p_isz):
    """VMEM bytes per batch row: pipelined tiles + in-kernel intermediates."""
    return (2 * D * x_isz      # x tile (double-buffered)
            + 2 * D * o_isz    # out tile (double-buffered)
            + D * p_isz        # x cast to param dtype (in-kernel temp)
            + H * 4            # h in f32
            + H * p_isz        # h cast to param dtype
            + D * 4)           # y in f32 before the output cast


def _pick_tm(B, max_tm, num_tc):
    """Largest row tile that (a) divides B, (b) fits the VMEM budget, and
    (c) leaves >= 2 grid steps per TensorCore on multi-TC chips (so DMA and
    compute overlap); on single-TC chips tm may be the whole batch."""
    candidates = [c for c in (4096, 2048, 1024, 512, 256, 128, 64, 32, 16, 8)
                  if c <= B]
    min_steps = 2 * num_tc if num_tc > 1 else 1
    for required in (min_steps, num_tc, 1):
        for c in candidates:
            if B % c == 0 and c <= max_tm and B // c >= required:
                return c
    # Last resort: full batch (block dim then equals the array dim, always legal).
    return B


def time_autoencoder(x, w1, b1, w2, b2, *, tm=None, param_dtype=None,
                     out_dtype=None, alias_input=False):
    """Fused forward pass: decoder(encoder(x)).

    x  : [B, D] (float32 or bfloat16)
    w1 : [D, H] encoder weight (in, out),  b1 : [1, H]
    w2 : [H, D] decoder weight (in, out),  b2 : [1, D]
    out_dtype   : output dtype; pass jnp.bfloat16 to halve HBM writeback
                  (the kernel is HBM-bandwidth-bound for typical H).
    alias_input : alias x's HBM buffer to the output (only if x is dead after
                  the call and out_dtype == x.dtype); saves a [B, D] buffer.
    """
    B, D = x.shape
    H = w1.shape[1]
    assert w1.shape == (D, H) and w2.shape == (H, D)
    assert b1.shape == (1, H) and b2.shape == (1, D)
    if D % 128 != 0:
        # Lane-dense output is the biggest measured store-path lever.
        raise ValueError(
            f"D={D} must be a multiple of 128 for unmasked (lane-dense) "
            "output stores; pad D or use a transposed output orientation.")

    if param_dtype is None:
        param_dtype = _default_param_dtype()
    if out_dtype is None:
        out_dtype = x.dtype

    x_isz = jnp.dtype(x.dtype).itemsize
    o_isz = jnp.dtype(out_dtype).itemsize
    p_isz = jnp.dtype(param_dtype).itemsize

    # Resident (single-buffered) constants.
    resident = 2 * D * H * p_isz + (H + D) * 4
    headroom = 8 << 20                              # Mosaic internal scratch
    cap = _vmem_capacity_bytes() - (16 << 20)       # 112 MiB on v5e/v6e, 48 MiB on v7x
    budget = cap - headroom

    per_row = _per_row_vmem_bytes(D, H, x_isz, o_isz, p_isz)
    avail = budget - resident
    if avail < 8 * per_row:
        # TODO(synk): for very large D*H, add a hidden-dim (H) grid axis with
        # an f32 VMEM accumulator (init/finalize via pl.when) instead of
        # keeping both weights fully resident (matters on v7x's 64 MiB VMEM).
        raise ValueError("resident weights leave no VMEM for row tiles; "
                         "split the hidden dimension")

    num_tc = _num_tensorcores()
    if tm is None:
        tm = _pick_tm(B, avail // per_row, num_tc)
    assert B % tm == 0, "batch must be divisible by the row tile"
    grid = (B // tm,)

    vmem_limit = int(min(resident + tm * per_row + headroom, cap))

    flops = 4 * B * D * H + 3 * B * H + 2 * B * D   # two matmuls + bias/relu
    bytes_accessed = (B * D * (x_isz + o_isz)       # x in, y out
                      + 2 * D * H * p_isz           # W1, W2
                      + (H + D) * 4)                # biases
    cost = pl.CostEstimate(flops=flops, transcendentals=0,
                           bytes_accessed=bytes_accessed)

    in_specs = [
        pl.BlockSpec((tm, D), lambda i: (i, 0)),                    # x row tile
        pl.BlockSpec((D, H), lambda i: (0, 0),
                     pipeline_mode=pl.Buffered(1)),                 # W1 resident
        pl.BlockSpec((1, H), lambda i: (0, 0),
                     pipeline_mode=pl.Buffered(1)),                 # b1
        pl.BlockSpec((H, D), lambda i: (0, 0),
                     pipeline_mode=pl.Buffered(1)),                 # W2 resident
        pl.BlockSpec((1, D), lambda i: (0, 0),
                     pipeline_mode=pl.Buffered(1)),                 # b2
    ]
    out_spec = pl.BlockSpec((tm, D), lambda i: (i, 0))              # lane-dense

    extra = {}
    if alias_input:
        if jnp.dtype(out_dtype) != jnp.dtype(x.dtype):
            raise ValueError("alias_input requires out_dtype == x.dtype")
        # Safe because x and out use identical (tm, D) tiles / index_map.
        extra["input_output_aliases"] = {0: 0}

    fn = pl.pallas_call(
        _autoencoder_kernel,
        out_shape=jax.ShapeDtypeStruct((B, D), out_dtype),
        grid_spec=pltpu.PrefetchScalarGridSpec(
            num_scalar_prefetch=0,
            grid=grid,
            in_specs=in_specs,
            out_specs=out_spec,
        ),
        compiler_params=pltpu.CompilerParams(
            dimension_semantics=("parallel",),
            vmem_limit_bytes=vmem_limit),
        cost_estimate=cost,
        **extra,
    )
    return fn(x,
              w1.astype(param_dtype), b1.astype(jnp.float32),
              w2.astype(param_dtype), b2.astype(jnp.float32))


def _reference(x, w1, b1, w2, b2, *, param_dtype):
    # Mirror the kernel's operand rounding (operands rounded to param_dtype
    # before each matmul, f32 accumulation with HIGHEST precision).
    hi = jax.lax.Precision.HIGHEST
    f32 = jnp.float32
    xc = x.astype(param_dtype).astype(f32)
    w1c = w1.astype(param_dtype).astype(f32)
    w2c = w2.astype(param_dtype).astype(f32)
    h = jnp.maximum(jnp.dot(xc, w1c, precision=hi) + b1.astype(f32), 0.0)
    hc = h.astype(param_dtype).astype(f32)
    return jnp.dot(hc, w2c, precision=hi) + b2.astype(f32)


if __name__ == "__main__":
    # Small deterministic shapes: D multiple of 128 (lane-dense output);
    # B=512 gives one grid step on single-TC chips and 4 steps on v7x.
    B, D, H = 512, 256, 128

    key = jax.random.PRNGKey(0)
    kx, k1, k2, k3, k4 = jax.random.split(key, 5)

    x = jax.random.normal(kx, (B, D), dtype=jnp.float32)
    w1 = jax.random.normal(k1, (D, H), dtype=jnp.float32) * (1.0 / jnp.sqrt(D))
    b1 = jax.random.normal(k2, (1, H), dtype=jnp.float32) * 0.01
    w2 = jax.random.normal(k3, (H, D), dtype=jnp.float32) * (1.0 / jnp.sqrt(H))
    b2 = jax.random.normal(k4, (1, D), dtype=jnp.float32) * 0.01

    pd = _default_param_dtype()
    out = jax.block_until_ready(
        time_autoencoder(x, w1, b1, w2, b2, param_dtype=pd))

    ref = _reference(x, w1, b1, w2, b2, param_dtype=pd)
    tol = 1e-3 if jnp.dtype(pd) == jnp.dtype(jnp.float32) else 2e-2
    assert out.shape == (B, D)
    assert out.dtype == x.dtype
    assert jnp.allclose(out, ref, atol=tol, rtol=tol), "mismatch vs reference"

    print("KERNEL_OK")
</pallas_src>

<mosaic_0001>
module attributes {stable_mosaic.version = 11 : i64} {
  func.func @_autoencoder_kernel(%arg0: i32, %arg1: memref<512x256xf32, #tpu.memory_space<vmem>>, %arg2: memref<256x128xbf16, #tpu.memory_space<vmem>>, %arg3: memref<1x128xf32, #tpu.memory_space<vmem>>, %arg4: memref<128x256xbf16, #tpu.memory_space<vmem>>, %arg5: memref<1x256xf32, #tpu.memory_space<vmem>>, %arg6: memref<512x256xf32, #tpu.memory_space<vmem>>) attributes {dimension_semantics = [#tpu.dimension_semantics<parallel>], iteration_bounds = array<i64: 1>, scalar_prefetch = 0 : i64, scratch_operands = 0 : i64, tpu.core_type = #tpu.core_type<tc>, window_params = [{transform_indices = @transform_0, window_bounds = array<i64: 512, 256>}, {pipeline_mode = #tpu.pipeline_mode<synchronous>, transform_indices = @transform_1, window_bounds = array<i64: 256, 128>}, {pipeline_mode = #tpu.pipeline_mode<synchronous>, transform_indices = @transform_2, window_bounds = array<i64: 1, 128>}, {pipeline_mode = #tpu.pipeline_mode<synchronous>, transform_indices = @transform_3, window_bounds = array<i64: 128, 256>}, {pipeline_mode = #tpu.pipeline_mode<synchronous>, transform_indices = @transform_4, window_bounds = array<i64: 1, 256>}, {transform_indices = @transform_5, window_bounds = array<i64: 512, 256>}]} {
    %c0 = arith.constant 0 : index
    %c0_0 = arith.constant 0 : index
    %0 = vector.load %arg1[%c0, %c0_0] : memref<512x256xf32, #tpu.memory_space<vmem>>, vector<512x256xf32>
    %1 = arith.truncf %0 : vector<512x256xf32> to vector<512x256xbf16>
    %c0_1 = arith.constant 0 : index
    %c0_2 = arith.constant 0 : index
    %2 = vector.load %arg2[%c0_1, %c0_2] : memref<256x128xbf16, #tpu.memory_space<vmem>>, vector<256x128xbf16>
    %cst = arith.constant dense<0.000000e+00> : vector<512x128xf32>
    %3 = tpu.matmul %1, %2, %cst {dimension_numbers = #tpu.dot_dimension_numbers<[1], [0], [0], [1], [0, 0, 1, 1], [], []>} : vector<512x256xbf16>, vector<256x128xbf16>, vector<512x128xf32> -> vector<512x128xf32>
    %c0_3 = arith.constant 0 : index
    %c0_4 = arith.constant 0 : index
    %4 = vector.load %arg3[%c0_3, %c0_4] : memref<1x128xf32, #tpu.memory_space<vmem>>, vector<1x128xf32>
    %5 = vector.broadcast %4 : vector<1x128xf32> to vector<512x128xf32>
    %6 = arith.addf %3, %5 : vector<512x128xf32>
    %cst_5 = arith.constant 0.000000e+00 : f32
    %7 = vector.broadcast %cst_5 : f32 to vector<512x128xf32>
    %8 = arith.maximumf %6, %7 : vector<512x128xf32>
    %9 = arith.truncf %8 : vector<512x128xf32> to vector<512x128xbf16>
    %c0_6 = arith.constant 0 : index
    %c0_7 = arith.constant 0 : index
    %10 = vector.load %arg4[%c0_6, %c0_7] : memref<128x256xbf16, #tpu.memory_space<vmem>>, vector<128x256xbf16>
    %cst_8 = arith.constant dense<0.000000e+00> : vector<512x256xf32>
    %11 = tpu.matmul %9, %10, %cst_8 {dimension_numbers = #tpu.dot_dimension_numbers<[1], [0], [0], [1], [0, 0, 1, 1], [], []>} : vector<512x128xbf16>, vector<128x256xbf16>, vector<512x256xf32> -> vector<512x256xf32>
    %c0_9 = arith.constant 0 : index
    %c0_10 = arith.constant 0 : index
    %12 = vector.load %arg5[%c0_9, %c0_10] : memref<1x256xf32, #tpu.memory_space<vmem>>, vector<1x256xf32>
    %13 = vector.broadcast %12 : vector<1x256xf32> to vector<512x256xf32>
    %14 = arith.addf %11, %13 : vector<512x256xf32>
    %c0_11 = arith.constant 0 : index
    %c0_12 = arith.constant 0 : index
    %15 = vector.load %arg6[%c0_11, %c0_12] : memref<512x256xf32, #tpu.memory_space<vmem>>, vector<512x256xf32>
    tpu.vector_store %arg6[%c0_11, %c0_12], %14 {strides = array<i32>} : memref<512x256xf32, #tpu.memory_space<vmem>>, vector<512x256xf32>,
    return
  }
  func.func @transform_0(%arg0: i32) -> (i32, i32) {
    %c0_i32 = arith.constant 0 : i32
    %c0_i32_0 = arith.constant 0 : i32
    return %arg0, %c0_i32 : i32, i32
  }
  func.func @transform_1(%arg0: i32) -> (i32, i32) {
    %c0_i32 = arith.constant 0 : i32
    %c0_i32_0 = arith.constant 0 : i32
    %c0_i32_1 = arith.constant 0 : i32
    return %c0_i32, %c0_i32_0 : i32, i32
  }
  func.func @transform_2(%arg0: i32) -> (i32, i32) {
    %c0_i32 = arith.constant 0 : i32
    %c0_i32_0 = arith.constant 0 : i32
    %c0_i32_1 = arith.constant 0 : i32
    return %c0_i32, %c0_i32_0 : i32, i32
  }
  func.func @transform_3(%arg0: i32) -> (i32, i32) {
    %c0_i32 = arith.constant 0 : i32
    %c0_i32_0 = arith.constant 0 : i32
    %c0_i32_1 = arith.constant 0 : i32
    return %c0_i32, %c0_i32_0 : i32, i32
  }
  func.func @transform_4(%arg0: i32) -> (i32, i32) {
    %c0_i32 = arith.constant 0 : i32
    %c0_i32_0 = arith.constant 0 : i32
    %c0_i32_1 = arith.constant 0 : i32
    return %c0_i32, %c0_i32_0 : i32, i32
  }
  func.func @transform_5(%arg0: i32) -> (i32, i32) {
    %c0_i32 = arith.constant 0 : i32
    %c0_i32_0 = arith.constant 0 : i32
    return %arg0, %c0_i32 : i32, i32
  }
}

</mosaic_0001>

<bundles_post_ra>
// kernel: tpu_custom_call.1
= control target key start
LH: loop header
LB: loop body
LE: loop exit
PB: predicated region body
PF: predicated region fallthrough
CT: control target
= control target key end

     0   :  { %10 = vsyncpa [#allocation3], 0  ;;  %s1907_s0 = inlined_call_operand.hbm [shape: f32[512,256], index: 0, kind: input, shape index: {}]   ;;  %s1908_s1 = inlined_call_operand.hbm [shape: bf16[256,128], index: 1, kind: input, shape index: {}]   ;;  %s1909_s2 = inlined_call_operand.vmem [shape: f32[1,128], index: 2, kind: input, shape index: {}]   ;;  %s1910_s3 = inlined_call_operand.hbm [shape: bf16[128,256], index: 3, kind: input, shape index: {}]   ;;  %s1911_s4 = inlined_call_operand.vmem [shape: f32[1,256], index: 4, kind: input, shape index: {}]   ;;  %s1912_s5 = inlined_call_operand.hbm [shape: f32[512,256], index: 5, kind: output, shape index: {}]  }
   0x1   :  { %11 = vsyncpa [#allocation6], 0 }
   0x2   :  { %12 = vsyncpa [#allocation4], 0  ;;  %s1560_s18 = smov [#allocation5]   ;;  %s1466_s22 = scalar_lea.hbm %s1908_s1, 2048 }
   0x3   :  { %s30_s19 = sshll.u32 %s1560_s18, 4  ;;  %p1467_p0 = scmp.ne.s32.totalorder %s1908_s1, %s1466_s22  ;;  %s31_s19 = int_to_ptr.vmem [resolvable:$true] %s30_s19 }
   0x4   :  { %p1470_p1 = scmp.lt.u32.totalorder %s1466_s22, %s1908_s1 }
   0x6   :  { %p1472_p2 = pnand %p1470_p1, %p1467_p0 }
   0x8   :  { %1475 = shalt.err (!%p1472_p2)
}
   0x9   :  { %s1476_s27 = scalar_lea.vmem %s31_s19, 2048  ;;  %p1481_p4 = scmp.lt.s32.totalorder %s31_s19, %s31_s19 }
   0xa   :  { %p1477_p3 = scmp.ne.s32.totalorder %s31_s19, %s1476_s27  ;;  %p1482_p5 = scmp.lt.s32.totalorder %s1476_s27, %s1476_s27 }
   0xc   :  { %p1483_p6 = por %p1482_p5, %p1481_p4 }
   0xe   :  { %p1484_p7 = pnand %p1483_p6, %p1477_p3 }
  0x10   :  { %1487 = shalt.err (!%p1484_p7)
}
  0x11   :  { %s1561_s28 = smov 64   ;;  %s1562_s29 = smov 4  }
  0x12   :  { %36 = dma.hbm_to_vmem [thread:$0]  %s1908_s1, 2048, %s31_s19, [#allocation6], %s1561_s28, %s1561_s28, %s1562_s29  }
  0x13   :  { %s1563_s7 = smov [#allocation2]   ;;  %s1488_s11 = scalar_lea.hbm %s1907_s0, 16384 }
  0x14   :  { %s18_s8 = sshll.u32 %s1563_s7, 4  ;;  %p1489_p8 = scmp.ne.s32.totalorder %s1907_s0, %s1488_s11  ;;  %s19_s8 = int_to_ptr.vmem [resolvable:$true] %s18_s8 }
  0x15   :  { %p1492_p9 = scmp.lt.u32.totalorder %s1488_s11, %s1907_s0 }
  0x17   :  { %p1494_p10 = pnand %p1492_p9, %p1489_p8 }
  0x19   :  { %1497 = shalt.err (!%p1494_p10)
}
  0x1a   :  { %s1498_s16 = scalar_lea.vmem %s19_s8, 16384  ;;  %p1503_p12 = scmp.lt.s32.totalorder %s19_s8, %s19_s8 }
  0x1b   :  { %p1499_p11 = scmp.ne.s32.totalorder %s19_s8, %s1498_s16  ;;  %p1504_p13 = scmp.lt.s32.totalorder %s1498_s16, %s1498_s16 }
  0x1d   :  { %p1505_p0 = por %p1504_p13, %p1503_p12 }
  0x1f   :  { %p1506_p1 = pnand %p1505_p0, %p1499_p11 }
  0x21   :  { %1509 = shalt.err (!%p1506_p1)
}
  0x22   :  { %s1564_s1 = smov 256   ;;  %s1565_s17 = smov 16  }
  0x23   :  { %24 = dma.hbm_to_vmem [thread:$0]  %s1907_s0, 16384, %s19_s8, [#allocation3], %s1564_s1, %s1564_s1, %s1565_s17  }
  0x24   :  { %s1566_s20 = smov [#allocation7]   ;;  %s1510_s24 = scalar_lea.hbm %s1910_s3, 2048 }
  0x25   :  { %s44_s21 = sshll.u32 %s1566_s20, 4  ;;  %p1511_p2 = scmp.ne.s32.totalorder %s1910_s3, %s1510_s24  ;;  %s45_s21 = int_to_ptr.vmem [resolvable:$true] %s44_s21 }
  0x26   :  { %p1514_p3 = scmp.lt.u32.totalorder %s1510_s24, %s1910_s3 }
  0x28   :  { %p1516_p4 = pnand %p1514_p3, %p1511_p2 }
  0x2a   :  { %1519 = shalt.err (!%p1516_p4)
}
  0x2b   :  { %s1520_s29 = scalar_lea.vmem %s45_s21, 2048  ;;  %p1525_p6 = scmp.lt.s32.totalorder %s45_s21, %s45_s21 }
  0x2c   :  { %p1521_p5 = scmp.ne.s32.totalorder %s45_s21, %s1520_s29  ;;  %p1526_p7 = scmp.lt.s32.totalorder %s1520_s29, %s1520_s29 }
  0x2e   :  { %p1527_p8 = por %p1526_p7, %p1525_p6 }
  0x30   :  { %p1528_p9 = pnand %p1527_p8, %p1521_p5 }
  0x32   :  { %1531 = shalt.err (!%p1528_p9)
}
  0x33   :  { %s1567_s0 = smov 128   ;;  %s1568_s30 = smov 8  }
  0x34   :  { %50 = dma.hbm_to_vmem [thread:$0]  %s1910_s3, 2048, %s45_s21, [#allocation6], %s1567_s0, %s1567_s0, %s1568_s30  }
  0x35   :  { %1554 = dma.done.wait [#allocation3], 16384  }
  0x36   :  { %1555 = vsyncadd [#allocation3], 4294950912 }
  0x37   :  { %1556 = dma.done.wait [#allocation6], 4096  }
  0x38   :  { %1557 = vsyncadd [#allocation6], 4294963200  ;;  %v1569_v0 = vmov 0   ;;  %v1426_v1 = vld [vmem:[#allocation5] sm:$0xff]   ;;  %v1427_v2 = vld [vmem:[#allocation5 + $0x8] sm:$0xff]  }
  0x39   :  { %390 = vmatprep.subr.bf16.mxu0 %v1569_v0  ;;  %915 = vmatprep.mubr.bf16.mxu1 %v1569_v0  ;;  %v1428_v3 = vld [vmem:[#allocation5 + $0x10] sm:$0xff]   ;;  %v1429_v4 = vld [vmem:[#allocation5 + $0x18] sm:$0xff]   ;;  %v1430_v5 = vld [vmem:[#allocation5 + $0x20] sm:$0xff]  }
  0x3a   :  { %391 = vmatpush1.bf16.msra.mxu0 %v1426_v1  ;;  %v64_v6 = vld [vmem:[#allocation2 + $0x8] sm:$0xff]  ;;  %v66_v7 = vld [vmem:[#allocation2 + $0x18] sm:$0xff]  ;;  %v1432_v10 = vld [vmem:[#allocation5 + $0x30] sm:$0xff]  }
  0x3b   :  { %392 = vmatprep.subr.bf16.mxu0 %v1569_v0  ;;  %v192_v8 = vpack.c.bf16 %v66_v7, %v64_v6  ;;  %v1431_v9 = vld [vmem:[#allocation5 + $0x28] sm:$0xff]   ;;  %v1433_v11 = vld [vmem:[#allocation5 + $0x38] sm:$0xff]   ;;  %v1434_v12 = vld [vmem:[#allocation5 + $0x40] sm:$0xff]  }
  0x3c   :  { %v1435_v13 = vld [vmem:[#allocation5 + $0x48] sm:$0xff]   ;;  %v1436_v14 = vld [vmem:[#allocation5 + $0x50] sm:$0xff]   ;;  %v1437_v15 = vld [vmem:[#allocation5 + $0x58] sm:$0xff]  }
  0x3d   :  { %422 = vmatprep.mubr.bf16.mxu0 %v192_v8  ;;  %v1438_v16 = vld [vmem:[#allocation5 + $0x60] sm:$0xff]   ;;  %v1439_v17 = vld [vmem:[#allocation5 + $0x68] sm:$0xff]   ;;  %v1440_v18 = vld [vmem:[#allocation5 + $0x70] sm:$0xff]  }
  0x3e   :  { %393 = vmatpush1.bf16.msra.mxu0 %v1427_v2  ;;  %v1441_v19 = vld [vmem:[#allocation5 + $0x78] sm:$0xff]   ;;  %v63_v20 = vld [vmem:[#allocation2] sm:$0xff]  ;;  %v65_v21 = vld [vmem:[#allocation2 + $0x10] sm:$0xff] }
  0x3f   :  { %394 = vmatprep.subr.bf16.mxu0 %v1569_v0  ;;  %v68_v22 = vld [vmem:[#allocation2 + $0x28] sm:$0xff]  ;;  %v70_v23 = vld [vmem:[#allocation2 + $0x38] sm:$0xff]  ;;  %v191_v24 = vpack.c.bf16 %v65_v21, %v63_v20  ;;  %v67_v26 = vld [vmem:[#allocation2 + $0x20] sm:$0xff] }
  0x40   :  { %v194_v25 = vpack.c.bf16 %v70_v23, %v68_v22  ;;  %v69_v27 = vld [vmem:[#allocation2 + $0x30] sm:$0xff]  ;;  %v72_v28 = vld [vmem:[#allocation2 + $0x48] sm:$0xff]  ;;  %v74_v29 = vld [vmem:[#allocation2 + $0x58] sm:$0xff] }
  0x41   :  { %v193_v30 = vpack.c.bf16 %v69_v27, %v67_v26  ;;  %v196_v31 = vpack.c.bf16 %v74_v29, %v72_v28  ;;  %v71_v32 = vld [vmem:[#allocation2 + $0x40] sm:$0xff]  ;;  %v73_v33 = vld [vmem:[#allocation2 + $0x50] sm:$0xff]  ;;  %v76_v34 = vld [vmem:[#allocation2 + $0x68] sm:$0xff] }
  0x42   :  { %395 = vmatpush1.bf16.msra.mxu0 %v1428_v3  ;;  %v78_v35 = vld [vmem:[#allocation2 + $0x78] sm:$0xff]  ;;  %v195_v36 = vpack.c.bf16 %v73_v33, %v71_v32  ;;  %v75_v38 = vld [vmem:[#allocation2 + $0x60] sm:$0xff]  ;;  %v77_v39 = vld [vmem:[#allocation2 + $0x70] sm:$0xff] }
  0x43   :  { %396 = vmatprep.subr.bf16.mxu0 %v1569_v0  ;;  %v198_v37 = vpack.c.bf16 %v78_v35, %v76_v34  ;;  %v80_v40 = vld [vmem:[#allocation2 + $0x88] sm:$0xff]  ;;  %v82_v41 = vld [vmem:[#allocation2 + $0x98] sm:$0xff]  ;;  %v197_v42 = vpack.c.bf16 %v77_v39, %v75_v38  ;;  %v79_v44 = vld [vmem:[#allocation2 + $0x80] sm:$0xff] }
  0x44   :  { %v200_v43 = vpack.c.bf16 %v82_v41, %v80_v40  ;;  %v81_v45 = vld [vmem:[#allocation2 + $0x90] sm:$0xff]  ;;  %v84_v46 = vld [vmem:[#allocation2 + $0xa8] sm:$0xff]  ;;  %v86_v47 = vld [vmem:[#allocation2 + $0xb8] sm:$0xff] }
  0x45   :  { %v199_v48 = vpack.c.bf16 %v81_v45, %v79_v44  ;;  %v202_v49 = vpack.c.bf16 %v86_v47, %v84_v46  ;;  %v83_v50 = vld [vmem:[#allocation2 + $0xa0] sm:$0xff]  ;;  %v85_v51 = vld [vmem:[#allocation2 + $0xb0] sm:$0xff]  ;;  %v88_v52 = vld [vmem:[#allocation2 + $0xc8] sm:$0xff] }
  0x46   :  { %397 = vmatpush1.bf16.msra.mxu0 %v1429_v4  ;;  %v90_v53 = vld [vmem:[#allocation2 + $0xd8] sm:$0xff]  ;;  %v201_v54 = vpack.c.bf16 %v85_v51, %v83_v50  ;;  %v87_v56 = vld [vmem:[#allocation2 + $0xc0] sm:$0xff]  ;;  %v89_v57 = vld [vmem:[#allocation2 + $0xd0] sm:$0xff] }
  0x47   :  { %398 = vmatprep.subr.bf16.mxu0 %v1569_v0  ;;  %v204_v55 = vpack.c.bf16 %v90_v53, %v88_v52  ;;  %v92_v58 = vld [vmem:[#allocation2 + $0xe8] sm:$0xff]  ;;  %v94_v59 = vld [vmem:[#allocation2 + $0xf8] sm:$0xff]  ;;  %v203_v60 = vpack.c.bf16 %v89_v57, %v87_v56  ;;  %v91_v62 = vld [vmem:[#allocation2 + $0xe0] sm:$0xff] }
  0x48   :  { %v206_v61 = vpack.c.bf16 %v94_v59, %v92_v58  ;;  %v93_v63 = vld [vmem:[#allocation2 + $0xf0] sm:$0xff]  ;;  %v96_v1 = vld [vmem:[#allocation2 + $0x108] sm:$0xff]  ;;  %v98_v2 = vld [vmem:[#allocation2 + $0x118] sm:$0xff] }
  0x49   :  { %v205_v3 = vpack.c.bf16 %v93_v63, %v91_v62  ;;  %v208_v4 = vpack.c.bf16 %v98_v2, %v96_v1  ;;  %v1444_v6 = vld [vmem:[#allocation7] ss:$8 sps:$4 sm:$0xff]   ;;  %v97_v8 = vld [vmem:[#allocation2 + $0x110] sm:$0xff]  ;;  %v106_v20 = vld [vmem:[#allocation2 + $0x158] sm:$0xff] }
  0x4a   :  { %399 = vmatpush1.bf16.msra.mxu0 %v1430_v5  ;;  %v1442_v5 = vld [vmem:[#allocation7 + $0x4] ss:$8 sps:$4 sm:$0xff]   ;;  %v1451_v23 = vld [vmem:[#allocation7 + $0x34] ss:$8 sps:$4 sm:$0xff]   ;;  %v1456_v28 = vld [vmem:[#allocation7 + $0x40] ss:$8 sps:$4 sm:$0xff]  }
  0x4b   :  { %400 = vmatprep.subr.bf16.mxu0 %v1569_v0  ;;  %v95_v7 = vld [vmem:[#allocation2 + $0x100] sm:$0xff]  ;;  %883 = vmatprep.subr.bf16.mxu1 %v1442_v5  ;;  %v105_v27 = vld [vmem:[#allocation2 + $0x150] sm:$0xff]  ;;  %v108_v29 = vld [vmem:[#allocation2 + $0x168] sm:$0xff] }
  0x4c   :  { %884 = vmatpush1.bf16.msra.mxu1 %v1444_v6  ;;  %v103_v26 = vld [vmem:[#allocation2 + $0x140] sm:$0xff]  ;;  %v1457_v33 = vld [vmem:[#allocation7 + $0x54] ss:$8 sps:$4 sm:$0xff]   ;;  %v1459_v34 = vld [vmem:[#allocation7 + $0x50] ss:$8 sps:$4 sm:$0xff]  }
  0x4d   :  { %v107_v35 = vld [vmem:[#allocation2 + $0x160] sm:$0xff]  ;;  %v114_v38 = vld [vmem:[#allocation2 + $0x198] sm:$0xff]  ;;  %v113_v46 = vld [vmem:[#allocation2 + $0x190] sm:$0xff] }
  0x4e   :  { %401 = vmatpush1.bf16.msra.mxu0 %v1431_v9  ;;  %v100_v9 = vld [vmem:[#allocation2 + $0x128] sm:$0xff]  ;;  %v1465_v44 = vld [vmem:[#allocation7 + $0x70] ss:$8 sps:$4 sm:$0xff]   ;;  %v111_v45 = vld [vmem:[#allocation2 + $0x180] sm:$0xff] }
  0x4f   :  { %402 = vmatprep.subr.bf16.mxu0 %v1569_v0  ;;  %v1460_v39 = vld [vmem:[#allocation7 + $0x64] ss:$8 sps:$4 sm:$0xff]   ;;  %v1462_v40 = vld [vmem:[#allocation7 + $0x60] ss:$8 sps:$4 sm:$0xff]   ;;  %v117_v52 = vld [vmem:[#allocation2 + $0x1b0] sm:$0xff] }
  0x50   :  { %v116_v47 = vld [vmem:[#allocation2 + $0x1a8] sm:$0xff]  ;;  %v115_v51 = vld [vmem:[#allocation2 + $0x1a0] sm:$0xff]  ;;  %v121_v58 = vld [vmem:[#allocation2 + $0x1d0] sm:$0xff] }
  0x51   :  { %v120_v53 = vld [vmem:[#allocation2 + $0x1c8] sm:$0xff]  ;;  %v119_v57 = vld [vmem:[#allocation2 + $0x1c0] sm:$0xff]  ;;  %v125_v1 = vld [vmem:[#allocation2 + $0x1f0] sm:$0xff] }
  0x52   :  { %403 = vmatpush1.bf16.msra.mxu0 %v1432_v10  ;;  %v102_v10 = vld [vmem:[#allocation2 + $0x138] sm:$0xff]  ;;  %v124_v59 = vld [vmem:[#allocation2 + $0x1e8] sm:$0xff]  ;;  %v123_v63 = vld [vmem:[#allocation2 + $0x1e0] sm:$0xff] }
  0x53   :  { %404 = vmatprep.subr.bf16.mxu0 %v1569_v0  ;;  %v128_v2 = vld [vmem:[#allocation2 + $0x208] sm:$0xff]  ;;  %v127_v6 = vld [vmem:[#allocation2 + $0x200] sm:$0xff] }
  0x56   :  { %405 = vmatpush1.bf16.msra.mxu0 %v1433_v11  ;;  %v207_v11 = vpack.c.bf16 %v97_v8, %v95_v7  ;;  %v129_v7 = vld [vmem:[#allocation2 + $0x210] sm:$0xff]  ;;  %v132_v8 = vld [vmem:[#allocation2 + $0x228] sm:$0xff] }
  0x57   :  { %406 = vmatprep.subr.bf16.mxu0 %v1569_v0 }
  0x5a   :  { %407 = vmatpush1.bf16.msra.mxu0 %v1434_v12  ;;  %v210_v12 = vpack.c.bf16 %v102_v10, %v100_v9  ;;  %v134_v9 = vld [vmem:[#allocation2 + $0x238] sm:$0xff]  ;;  %v223_v10 = vpack.c.bf16 %v129_v7, %v127_v6 }
  0x5b   :  { %408 = vmatprep.subr.bf16.mxu0 %v1569_v0  ;;  %v174_v6 = vld [vmem:[#allocation2 + $0x378] sm:$0xff] }
  0x5e   :  { %409 = vmatpush1.bf16.msra.mxu0 %v1435_v13  ;;  %v1445_v13 = vld [vmem:[#allocation7 + $0x14] ss:$8 sps:$4 sm:$0xff]  }
  0x5f   :  { %410 = vmatprep.subr.bf16.mxu0 %v1569_v0  ;;  %885 = vmatprep.subr.bf16.mxu1 %v1445_v13  ;;  %v133_v13 = vld [vmem:[#allocation2 + $0x230] sm:$0xff] }
  0x62   :  { %411 = vmatpush1.bf16.msra.mxu0 %v1436_v14  ;;  %v1447_v14 = vld [vmem:[#allocation7 + $0x10] ss:$8 sps:$4 sm:$0xff]  }
  0x63   :  { %412 = vmatprep.subr.bf16.mxu0 %v1569_v0  ;;  %886 = vmatpush1.bf16.msra.mxu1 %v1447_v14  ;;  %v136_v14 = vld [vmem:[#allocation2 + $0x248] sm:$0xff] }
  0x66   :  { %413 = vmatpush1.bf16.msra.mxu0 %v1437_v15  ;;  %v1448_v15 = vld [vmem:[#allocation7 + $0x24] ss:$8 sps:$4 sm:$0xff]  }
  0x67   :  { %414 = vmatprep.subr.bf16.mxu0 %v1569_v0  ;;  %887 = vmatprep.subr.bf16.mxu1 %v1448_v15  ;;  %v138_v15 = vld [vmem:[#allocation2 + $0x258] sm:$0xff] }
  0x6a   :  { %415 = vmatpush1.bf16.msra.mxu0 %v1438_v16  ;;  %v99_v16 = vld [vmem:[#allocation2 + $0x120] sm:$0xff] }
  0x6b   :  { %416 = vmatprep.subr.bf16.mxu0 %v1569_v0 }
  0x6e   :  { %417 = vmatpush1.bf16.msra.mxu0 %v1439_v17  ;;  %v101_v17 = vld [vmem:[#allocation2 + $0x130] sm:$0xff] }
  0x6f   :  { %418 = vmatprep.subr.bf16.mxu0 %v1569_v0  ;;  %v209_v21 = vpack.c.bf16 %v101_v17, %v99_v16  ;;  %v228_v17 = vpack.c.bf16 %v138_v15, %v136_v14 }
  0x72   :  { %419 = vmatpush1.bf16.msra.mxu0 %v1440_v18  ;;  %v1450_v18 = vld [vmem:[#allocation7 + $0x20] ss:$8 sps:$4 sm:$0xff]  }
  0x73   :  { %420 = vmatprep.subr.bf16.mxu0 %v1569_v0  ;;  %888 = vmatpush1.bf16.msra.mxu1 %v1450_v18  ;;  %v135_v18 = vld [vmem:[#allocation2 + $0x240] sm:$0xff] }
  0x74   :  { %889 = vmatprep.subr.bf16.mxu1 %v1451_v23 }
  0x76   :  { %421 = vmatpush1.bf16.msra.mxu0 %v1441_v19  ;;  %v104_v19 = vld [vmem:[#allocation2 + $0x148] sm:$0xff] }
  0x77   :  { %v212_v22 = vpack.c.bf16 %v106_v20, %v104_v19  ;;  %v137_v19 = vld [vmem:[#allocation2 + $0x250] sm:$0xff]  ;;  %v140_v20 = vld [vmem:[#allocation2 + $0x268] sm:$0xff] }
  0x79   :  { %423 = vmatmul.mubr.bf16.vlgmr.msra.gmra.mrb[0].mxu0 %v191_v24  ;;  %v1453_v24 = vld [vmem:[#allocation7 + $0x30] ss:$8 sps:$4 sm:$0xff]  }
  0x7a   :  { %430 = vmatprep.mubr.bf16.mxu0 %v194_v25  ;;  %v1454_v25 = vld [vmem:[#allocation7 + $0x44] ss:$8 sps:$4 sm:$0xff]   ;;  %890 = vmatpush1.bf16.msra.mxu1 %v1453_v24 }
  0x7b   :  { %891 = vmatprep.subr.bf16.mxu1 %v1454_v25  ;;  %v139_v24 = vld [vmem:[#allocation2 + $0x260] sm:$0xff]  ;;  %v141_v25 = vld [vmem:[#allocation2 + $0x270] sm:$0xff] }
  0x7e   :  { %892 = vmatpush1.bf16.msra.mxu1 %v1456_v28  ;;  %v229_v28 = vpack.c.bf16 %v141_v25, %v139_v24  ;;  %v175_v24 = vld [vmem:[#allocation2 + $0x380] sm:$0xff]  ;;  %v177_v25 = vld [vmem:[#allocation2 + $0x390] sm:$0xff] }
  0x7f   :  { %893 = vmatprep.subr.bf16.mxu1 %v1457_v33  ;;  %v150_v33 = vld [vmem:[#allocation2 + $0x2b8] sm:$0xff] }
  0x81   :  { %431 = vmatmul.mubr.bf16.gmra.mrb[4].mxu0 %v193_v30  ;;  %v110_v30 = vld [vmem:[#allocation2 + $0x178] sm:$0xff] }
  0x82   :  { %438 = vmatprep.mubr.bf16.mxu0 %v196_v31  ;;  %v211_v31 = vpack.c.bf16 %v105_v27, %v103_v26  ;;  %v214_v32 = vpack.c.bf16 %v110_v30, %v108_v29  ;;  %894 = vmatpush1.bf16.msra.mxu1 %v1459_v34  ;;  %v144_v26 = vld [vmem:[#allocation2 + $0x288] sm:$0xff]  ;;  %v146_v27 = vld [vmem:[#allocation2 + $0x298] sm:$0xff]  ;;  %v143_v30 = vld [vmem:[#allocation2 + $0x280] sm:$0xff] }
  0x83   :  { %895 = vmatprep.subr.bf16.mxu1 %v1460_v39  ;;  %v232_v29 = vpack.c.bf16 %v146_v27, %v144_v26  ;;  %v154_v39 = vld [vmem:[#allocation2 + $0x2d8] sm:$0xff]  ;;  %v180_v27 = vld [vmem:[#allocation2 + $0x3a8] sm:$0xff] }
  0x86   :  { %896 = vmatpush1.bf16.msra.mxu1 %v1462_v40 }
  0x89   :  { %439 = vmatmul.mubr.bf16.gmra.mrb[8].mxu0 %v195_v36  ;;  %v109_v36 = vld [vmem:[#allocation2 + $0x170] sm:$0xff] }
  0x8a   :  { %446 = vmatprep.mubr.bf16.mxu0 %v198_v37  ;;  %v112_v37 = vld [vmem:[#allocation2 + $0x188] sm:$0xff]  ;;  %v213_v41 = vpack.c.bf16 %v109_v36, %v107_v35  ;;  %v147_v36 = vld [vmem:[#allocation2 + $0x2a0] sm:$0xff] }
  0x91   :  { %447 = vmatmul.mubr.bf16.gmra.mrb[12].mxu0 %v197_v42  ;;  %v216_v42 = vpack.c.bf16 %v114_v38, %v112_v37  ;;  %v149_v37 = vld [vmem:[#allocation2 + $0x2b0] sm:$0xff]  ;;  %v152_v38 = vld [vmem:[#allocation2 + $0x2c8] sm:$0xff] }
  0x92   :  { %454 = vmatprep.mubr.bf16.mxu0 %v200_v43  ;;  %v1463_v43 = vld [vmem:[#allocation7 + $0x74] ss:$8 sps:$4 sm:$0xff]   ;;  %v233_v40 = vpack.c.bf16 %v149_v37, %v147_v36 }
  0x93   :  { %897 = vmatprep.subr.bf16.mxu1 %v1463_v43  ;;  %v153_v43 = vld [vmem:[#allocation2 + $0x2d0] sm:$0xff] }
  0x94   :  { %898 = vmatpush1.bf16.msra.mxu1 %v1465_v44  ;;  %v156_v44 = vld [vmem:[#allocation2 + $0x2e8] sm:$0xff] }
  0x99   :  { %455 = vmatmul.mubr.bf16.gmra.mrb[16].mxu0 %v199_v48  ;;  %v118_v48 = vld [vmem:[#allocation2 + $0x1b8] sm:$0xff] }
  0x9a   :  { %462 = vmatprep.mubr.bf16.mxu0 %v202_v49  ;;  %v215_v49 = vpack.c.bf16 %v113_v46, %v111_v45  ;;  %v218_v50 = vpack.c.bf16 %v118_v48, %v116_v47  ;;  %v158_v45 = vld [vmem:[#allocation2 + $0x2f8] sm:$0xff]  ;;  %v155_v48 = vld [vmem:[#allocation2 + $0x2e0] sm:$0xff] }
  0x9b   :  { %v238_v47 = vpack.c.bf16 %v158_v45, %v156_v44 }
  0xa1   :  { %463 = vmatmul.mubr.bf16.gmra.mrb[20].mxu0 %v201_v54  ;;  %v122_v54 = vld [vmem:[#allocation2 + $0x1d8] sm:$0xff] }
  0xa2   :  { %470 = vmatprep.mubr.bf16.mxu0 %v204_v55  ;;  %v217_v55 = vpack.c.bf16 %v117_v52, %v115_v51  ;;  %v220_v56 = vpack.c.bf16 %v122_v54, %v120_v53  ;;  %v162_v51 = vld [vmem:[#allocation2 + $0x318] sm:$0xff]  ;;  %v159_v54 = vld [vmem:[#allocation2 + $0x300] sm:$0xff] }
  0xa9   :  { %471 = vmatmul.mubr.bf16.gmra.mrb[24].mxu0 %v203_v60  ;;  %v126_v60 = vld [vmem:[#allocation2 + $0x1f8] sm:$0xff] }
  0xaa   :  { %478 = vmatprep.mubr.bf16.mxu0 %v206_v61  ;;  %v219_v61 = vpack.c.bf16 %v121_v58, %v119_v57  ;;  %v222_v62 = vpack.c.bf16 %v126_v60, %v124_v59  ;;  %v166_v57 = vld [vmem:[#allocation2 + $0x338] sm:$0xff]  ;;  %v163_v60 = vld [vmem:[#allocation2 + $0x320] sm:$0xff] }
  0xb1   :  { %479 = vmatmul.mubr.bf16.gmra.mrb[28].mxu0 %v205_v3  ;;  %v130_v3 = vld [vmem:[#allocation2 + $0x218] sm:$0xff] }
  0xb2   :  { %486 = vmatprep.mubr.bf16.mxu0 %v208_v4  ;;  %v221_v4 = vpack.c.bf16 %v125_v1, %v123_v63  ;;  %v224_v5 = vpack.c.bf16 %v130_v3, %v128_v2  ;;  %v170_v63 = vld [vmem:[#allocation2 + $0x358] sm:$0xff]  ;;  %v167_v3 = vld [vmem:[#allocation2 + $0x340] sm:$0xff] }
  0xb9   :  { %487 = vmatmul.mubr.bf16.gmra.mrb[32].mxu0 %v207_v11  ;;  %v226_v11 = vpack.c.bf16 %v134_v9, %v132_v8  ;;  %v1660_v9 = vld [vmem:[%s1909_s2] ss:$0 sm:$0xff] }
  0xba   :  { %494 = vmatprep.mubr.bf16.mxu0 %v210_v12  ;;  %v131_v12 = vld [vmem:[#allocation2 + $0x220] sm:$0xff] }
  0xbb   :  { %v225_v16 = vpack.c.bf16 %v133_v13, %v131_v12  ;;  %v176_v12 = vld [vmem:[#allocation2 + $0x388] sm:$0xff]  ;;  %v178_v13 = vld [vmem:[#allocation2 + $0x398] sm:$0xff] }
  0xc1   :  { %495 = vmatmul.mubr.bf16.gmra.mrb[36].mxu0 %v209_v21  ;;  %v142_v21 = vld [vmem:[#allocation2 + $0x278] sm:$0xff] }
  0xc2   :  { %502 = vmatprep.mubr.bf16.mxu0 %v212_v22  ;;  %v227_v22 = vpack.c.bf16 %v137_v19, %v135_v18  ;;  %v230_v23 = vpack.c.bf16 %v142_v21, %v140_v20  ;;  %v248_v19 = vpack.c.bf16 %v178_v13, %v176_v12 }
  0xc9   :  { %503 = vmatmul.mubr.bf16.gmra.mrb[40].mxu0 %v211_v31  ;;  %v145_v31 = vld [vmem:[#allocation2 + $0x290] sm:$0xff] }
  0xca   :  { %510 = vmatprep.mubr.bf16.mxu0 %v214_v32  ;;  %v148_v32 = vld [vmem:[#allocation2 + $0x2a8] sm:$0xff]  ;;  %v231_v34 = vpack.c.bf16 %v145_v31, %v143_v30 }
  0xcb   :  { %v234_v35 = vpack.c.bf16 %v150_v33, %v148_v32  ;;  %v247_v32 = vpack.c.bf16 %v177_v25, %v175_v24 }
  0xd1   :  { %511 = vmatmul.mubr.bf16.gmra.mrb[44].mxu0 %v213_v41  ;;  %v236_v41 = vpack.c.bf16 %v154_v39, %v152_v38  ;;  %v179_v39 = vld [vmem:[#allocation2 + $0x3a0] sm:$0xff] }
  0xd2   :  { %518 = vmatprep.mubr.bf16.mxu0 %v216_v42  ;;  %v151_v42 = vld [vmem:[#allocation2 + $0x2c0] sm:$0xff] }
  0xd3   :  { %v235_v46 = vpack.c.bf16 %v153_v43, %v151_v42  ;;  %v184_v42 = vld [vmem:[#allocation2 + $0x3c8] sm:$0xff]  ;;  %v186_v43 = vld [vmem:[#allocation2 + $0x3d8] sm:$0xff] }
  0xd9   :  { %519 = vmatmul.mubr.bf16.gmra.mrb[48].mxu0 %v215_v49  ;;  %v157_v49 = vld [vmem:[#allocation2 + $0x2f0] sm:$0xff] }
  0xda   :  { %526 = vmatprep.mubr.bf16.mxu0 %v218_v50  ;;  %v160_v50 = vld [vmem:[#allocation2 + $0x308] sm:$0xff]  ;;  %v237_v52 = vpack.c.bf16 %v157_v49, %v155_v48  ;;  %v252_v49 = vpack.c.bf16 %v186_v43, %v184_v42 }
  0xdb   :  { %v240_v53 = vpack.c.bf16 %v162_v51, %v160_v50 }
  0xe1   :  { %527 = vmatmul.mubr.bf16.gmra.mrb[52].mxu0 %v217_v55  ;;  %v161_v55 = vld [vmem:[#allocation2 + $0x310] sm:$0xff] }
  0xe2   :  { %534 = vmatprep.mubr.bf16.mxu0 %v220_v56  ;;  %v164_v56 = vld [vmem:[#allocation2 + $0x328] sm:$0xff]  ;;  %v239_v58 = vpack.c.bf16 %v161_v55, %v159_v54  ;;  %v183_v54 = vld [vmem:[#allocation2 + $0x3c0] sm:$0xff]  ;;  %v185_v55 = vld [vmem:[#allocation2 + $0x3d0] sm:$0xff] }
  0xe3   :  { %v242_v59 = vpack.c.bf16 %v166_v57, %v164_v56  ;;  %v188_v57 = vld [vmem:[#allocation2 + $0x3e8] sm:$0xff] }
  0xe9   :  { %535 = vmatmul.mubr.bf16.gmra.mrb[56].mxu0 %v219_v61  ;;  %v165_v61 = vld [vmem:[#allocation2 + $0x330] sm:$0xff] }
  0xea   :  { %542 = vmatprep.mubr.bf16.mxu0 %v222_v62  ;;  %v168_v62 = vld [vmem:[#allocation2 + $0x348] sm:$0xff]  ;;  %v241_v1 = vpack.c.bf16 %v165_v61, %v163_v60 }
  0xeb   :  { %v244_v2 = vpack.c.bf16 %v170_v63, %v168_v62  ;;  %v251_v62 = vpack.c.bf16 %v185_v55, %v183_v54 }
  0xf1   :  { %543 = vmatmul.mubr.bf16.gmra.mrb[60].mxu0 %v221_v4  ;;  %v169_v4 = vld [vmem:[#allocation2 + $0x350] sm:$0xff] }
  0xf2   :  { %550 = vmatprep.mubr.bf16.mxu0 %v224_v5  ;;  %v172_v5 = vld [vmem:[#allocation2 + $0x368] sm:$0xff]  ;;  %v243_v7 = vpack.c.bf16 %v169_v4, %v167_v3 }
  0xf3   :  { %v246_v8 = vpack.c.bf16 %v174_v6, %v172_v5  ;;  %v187_v6 = vld [vmem:[#allocation2 + $0x3e0] sm:$0xff] }
  0xf9   :  { %551 = vmatmul.mubr.bf16.gmra.mrb[64].mxu0 %v223_v10  ;;  %v171_v10 = vld [vmem:[#allocation2 + $0x360] sm:$0xff] }
  0xfa   :  { %558 = vmatprep.mubr.bf16.mxu0 %v226_v11  ;;  %v173_v11 = vld [vmem:[#allocation2 + $0x370] sm:$0xff] }
 0x101   :  { %559 = vmatmul.mubr.bf16.gmra.mrb[68].mxu0 %v225_v16 }
 0x102   :  { %566 = vmatprep.mubr.bf16.mxu0 %v228_v17  ;;  %v245_v17 = vpack.c.bf16 %v173_v11, %v171_v10 }
 0x109   :  { %567 = vmatmul.mubr.bf16.gmra.mrb[72].mxu0 %v227_v22 }
 0x10a   :  { %574 = vmatprep.mubr.bf16.mxu0 %v230_v23 }
 0x111   :  { %575 = vmatmul.mubr.bf16.gmra.mrb[76].mxu0 %v229_v28  ;;  %v182_v28 = vld [vmem:[#allocation2 + $0x3b8] sm:$0xff] }
 0x112   :  { %582 = vmatprep.mubr.bf16.mxu0 %v232_v29 }
 0x119   :  { %583 = vmatmul.mubr.bf16.gmra.mrb[80].mxu0 %v231_v34  ;;  %v250_v34 = vpack.c.bf16 %v182_v28, %v180_v27 }
 0x11a   :  { %590 = vmatprep.mubr.bf16.mxu0 %v234_v35 }
 0x121   :  { %591 = vmatmul.mubr.bf16.gmra.mrb[84].mxu0 %v233_v40  ;;  %v181_v40 = vld [vmem:[#allocation2 + $0x3b0] sm:$0xff] }
 0x122   :  { %598 = vmatprep.mubr.bf16.mxu0 %v236_v41 }
 0x129   :  { %599 = vmatmul.mubr.bf16.gmra.mrb[88].mxu0 %v235_v46 }
 0x12a   :  { %606 = vmatprep.mubr.bf16.mxu0 %v238_v47  ;;  %v249_v47 = vpack.c.bf16 %v181_v40, %v179_v39 }
 0x131   :  { %607 = vmatmul.mubr.bf16.gmra.mrb[92].mxu0 %v237_v52 }
 0x132   :  { %614 = vmatprep.mubr.bf16.mxu0 %v240_v53 }
 0x139   :  { %615 = vmatmul.mubr.bf16.gmra.mrb[96].mxu0 %v239_v58  ;;  %v190_v58 = vld [vmem:[#allocation2 + $0x3f8] sm:$0xff] }
 0x13a   :  { %622 = vmatprep.mubr.bf16.mxu0 %v242_v59 }
 0x141   :  { %623 = vmatmul.mubr.bf16.gmra.mrb[100].mxu0 %v241_v1  ;;  %v254_v1 = vpack.c.bf16 %v190_v58, %v188_v57 }
 0x142   :  { %630 = vmatprep.mubr.bf16.mxu0 %v244_v2 }
 0x149   :  { %631 = vmatmul.mubr.bf16.gmra.mrb[104].mxu0 %v243_v7  ;;  %v189_v7 = vld [vmem:[#allocation2 + $0x3f0] sm:$0xff] }
 0x14a   :  { %638 = vmatprep.mubr.bf16.mxu0 %v246_v8  ;;  %v253_v13 = vpack.c.bf16 %v189_v7, %v187_v6 }
 0x14c   :  { %v424_v14 = vpop.f32.mrb[0].mxu0 }
 0x14d   :  { %v425_v15 = vadd.f32 %v1660_v9, %v424_v14  ;;  %v426_v16 = vpop.f32.mrb[1].mxu0 }
 0x14e   :  { %v427_v18 = vpop.f32.mrb[2].mxu0 }
 0x14f   :  { %v428_v20 = vadd.f32 %v1660_v9, %v427_v18  ;;  %v429_v21 = vpop.f32.mrb[3].mxu0  ;;  %v679_v22 = vmax.f32 %v425_v15, 0.0 }
 0x151   :  { %v680_v23 = vmax.f32 %v428_v20, 0.0  ;;  %639 = vmatmul.mubr.bf16.gmra.mrb[108].mxu0 %v245_v17 }
 0x152   :  { %646 = vmatprep.mubr.bf16.mxu0 %v248_v19 }
 0x153   :  { %v743_v26 = vpack.c.bf16 %v680_v23, %v679_v22 }
 0x154   :  { %v432_v29 = vpop.f32.mrb[4].mxu0 }
 0x155   :  { %v433_v30 = vadd.f32 %v1660_v9, %v432_v29  ;;  %v434_v31 = vpop.f32.mrb[5].mxu0  ;;  %916 = vmatmul.mubr.bf16.vlgmr.msra.gmra.mrb[0].mxu1 %v743_v26 }
 0x156   :  { %v435_v33 = vpop.f32.mrb[6].mxu0  ;;  %925 = vmatprep.mubr.bf16.mxu1 %v1569_v0 }
 0x157   :  { %v436_v35 = vadd.f32 %v1660_v9, %v435_v33  ;;  %v437_v36 = vpop.f32.mrb[7].mxu0  ;;  %v681_v37 = vmax.f32 %v433_v30, 0.0 }
 0x159   :  { %v682_v38 = vmax.f32 %v436_v35, 0.0  ;;  %647 = vmatmul.mubr.bf16.gmra.mrb[112].mxu0 %v247_v32 }
 0x15a   :  { %654 = vmatprep.mubr.bf16.mxu0 %v250_v34 }
 0x15b   :  { %v744_v41 = vpack.c.bf16 %v682_v38, %v681_v37 }
 0x15c   :  { %v440_v44 = vpop.f32.mrb[8].mxu0 }
 0x15d   :  { %v441_v45 = vadd.f32 %v1660_v9, %v440_v44  ;;  %v442_v46 = vpop.f32.mrb[9].mxu0  ;;  %926 = vmatmul.mubr.bf16.gmra.mrb[4].mxu1 %v744_v41 }
 0x15e   :  { %v443_v48 = vpop.f32.mrb[10].mxu0  ;;  %935 = vmatprep.mubr.bf16.mxu1 %v1569_v0 }
 0x15f   :  { %v444_v50 = vadd.f32 %v1660_v9, %v443_v48  ;;  %v445_v51 = vpop.f32.mrb[11].mxu0  ;;  %v683_v52 = vmax.f32 %v441_v45, 0.0 }
 0x161   :  { %v684_v53 = vmax.f32 %v444_v50, 0.0  ;;  %655 = vmatmul.mubr.bf16.gmra.mrb[116].mxu0 %v249_v47 }
 0x162   :  { %662 = vmatprep.mubr.bf16.mxu0 %v252_v49 }
 0x163   :  { %v745_v56 = vpack.c.bf16 %v684_v53, %v683_v52 }
 0x164   :  { %v448_v59 = vpop.f32.mrb[12].mxu0 }
 0x165   :  { %v449_v60 = vadd.f32 %v1660_v9, %v448_v59  ;;  %v450_v61 = vpop.f32.mrb[13].mxu0  ;;  %936 = vmatmul.mubr.bf16.gmra.mrb[8].mxu1 %v745_v56 }
 0x166   :  { %v451_v63 = vpop.f32.mrb[14].mxu0  ;;  %945 = vmatprep.mubr.bf16.mxu1 %v1569_v0 }
 0x167   :  { %v452_v2 = vadd.f32 %v1660_v9, %v451_v63  ;;  %v453_v3 = vpop.f32.mrb[15].mxu0  ;;  %v685_v4 = vmax.f32 %v449_v60, 0.0 }
 0x169   :  { %v686_v5 = vmax.f32 %v452_v2, 0.0  ;;  %663 = vmatmul.mubr.bf16.gmra.mrb[120].mxu0 %v251_v62 }
 0x16a   :  { %670 = vmatprep.mubr.bf16.mxu0 %v254_v1 }
 0x16b   :  { %v746_v8 = vpack.c.bf16 %v686_v5, %v685_v4 }
 0x16c   :  { %v456_v10 = vpop.f32.mrb[16].mxu0 }
 0x16d   :  { %v457_v11 = vadd.f32 %v1660_v9, %v456_v10  ;;  %v458_v12 = vpop.f32.mrb[17].mxu0  ;;  %946 = vmatmul.mubr.bf16.gmra.mrb[12].mxu1 %v746_v8 }
 0x16e   :  { %v459_v14 = vpop.f32.mrb[18].mxu0  ;;  %955 = vmatprep.mubr.bf16.mxu1 %v1569_v0 }
 0x16f   :  { %v460_v15 = vadd.f32 %v1660_v9, %v459_v14  ;;  %v461_v16 = vpop.f32.mrb[19].mxu0  ;;  %v687_v17 = vmax.f32 %v457_v11, 0.0 }
 0x171   :  { %v688_v18 = vmax.f32 %v460_v15, 0.0  ;;  %671 = vmatmul.mubr.bf16.gmra.mrb[124].mxu0 %v253_v13 }
 0x173   :  { %v747_v19 = vpack.c.bf16 %v688_v18, %v687_v17 }
 0x174   :  { %v464_v20 = vpop.f32.mrb[20].mxu0 }
 0x175   :  { %v465_v21 = vadd.f32 %v1660_v9, %v464_v20  ;;  %v466_v22 = vpop.f32.mrb[21].mxu0  ;;  %956 = vmatmul.mubr.bf16.gmra.mrb[16].mxu1 %v747_v19 }
 0x176   :  { %v467_v23 = vpop.f32.mrb[22].mxu0  ;;  %965 = vmatprep.mubr.bf16.mxu1 %v1569_v0 }
 0x177   :  { %v468_v24 = vadd.f32 %v1660_v9, %v467_v23  ;;  %v469_v25 = vpop.f32.mrb[23].mxu0  ;;  %v689_v26 = vmax.f32 %v465_v21, 0.0 }
 0x179   :  { %v690_v27 = vmax.f32 %v468_v24, 0.0 }
 0x17b   :  { %v748_v28 = vpack.c.bf16 %v690_v27, %v689_v26 }
 0x17c   :  { %v472_v29 = vpop.f32.mrb[24].mxu0 }
 0x17d   :  { %v473_v30 = vadd.f32 %v1660_v9, %v472_v29  ;;  %v474_v31 = vpop.f32.mrb[25].mxu0  ;;  %966 = vmatmul.mubr.bf16.gmra.mrb[20].mxu1 %v748_v28 }
 0x17e   :  { %v475_v32 = vpop.f32.mrb[26].mxu0  ;;  %975 = vmatprep.mubr.bf16.mxu1 %v1569_v0 }
 0x17f   :  { %v476_v33 = vadd.f32 %v1660_v9, %v475_v32  ;;  %v477_v34 = vpop.f32.mrb[27].mxu0  ;;  %v691_v35 = vmax.f32 %v473_v30, 0.0 }
 0x181   :  { %v692_v36 = vmax.f32 %v476_v33, 0.0 }
 0x183   :  { %v749_v37 = vpack.c.bf16 %v692_v36, %v691_v35 }
 0x184   :  { %v480_v38 = vpop.f32.mrb[28].mxu0 }
 0x185   :  { %v481_v39 = vadd.f32 %v1660_v9, %v480_v38  ;;  %v482_v40 = vpop.f32.mrb[29].mxu0  ;;  %976 = vmatmul.mubr.bf16.gmra.mrb[24].mxu1 %v749_v37 }
 0x186   :  { %v483_v41 = vpop.f32.mrb[30].mxu0  ;;  %985 = vmatprep.mubr.bf16.mxu1 %v1569_v0 }
 0x187   :  { %v484_v42 = vadd.f32 %v1660_v9, %v483_v41  ;;  %v485_v43 = vpop.f32.mrb[31].mxu0  ;;  %v693_v44 = vmax.f32 %v481_v39, 0.0 }
 0x189   :  { %v694_v45 = vmax.f32 %v484_v42, 0.0 }
 0x18b   :  { %v750_v46 = vpack.c.bf16 %v694_v45, %v693_v44 }
 0x18c   :  { %v488_v47 = vpop.f32.mrb[32].mxu0 }
 0x18d   :  { %v489_v48 = vadd.f32 %v1660_v9, %v488_v47  ;;  %v490_v49 = vpop.f32.mrb[33].mxu0  ;;  %986 = vmatmul.mubr.bf16.gmra.mrb[28].mxu1 %v750_v46 }
 0x18e   :  { %v491_v50 = vpop.f32.mrb[34].mxu0  ;;  %995 = vmatprep.mubr.bf16.mxu1 %v1569_v0 }
 0x18f   :  { %v492_v51 = vadd.f32 %v1660_v9, %v491_v50  ;;  %v493_v52 = vpop.f32.mrb[35].mxu0  ;;  %v695_v53 = vmax.f32 %v489_v48, 0.0 }
 0x191   :  { %v696_v54 = vmax.f32 %v492_v51, 0.0 }
 0x193   :  { %v751_v55 = vpack.c.bf16 %v696_v54, %v695_v53 }
 0x194   :  { %v496_v56 = vpop.f32.mrb[36].mxu0 }
 0x195   :  { %v497_v57 = vadd.f32 %v1660_v9, %v496_v56  ;;  %v498_v58 = vpop.f32.mrb[37].mxu0  ;;  %996 = vmatmul.mubr.bf16.gmra.mrb[32].mxu1 %v751_v55 }
 0x196   :  { %v499_v59 = vpop.f32.mrb[38].mxu0  ;;  %1005 = vmatprep.mubr.bf16.mxu1 %v1569_v0 }
 0x197   :  { %v500_v60 = vadd.f32 %v1660_v9, %v499_v59  ;;  %v501_v61 = vpop.f32.mrb[39].mxu0  ;;  %v697_v62 = vmax.f32 %v497_v57, 0.0 }
 0x199   :  { %v698_v63 = vmax.f32 %v500_v60, 0.0 }
 0x19b   :  { %v752_v1 = vpack.c.bf16 %v698_v63, %v697_v62 }
 0x19c   :  { %v504_v2 = vpop.f32.mrb[40].mxu0 }
 0x19d   :  { %v505_v3 = vadd.f32 %v1660_v9, %v504_v2  ;;  %v506_v4 = vpop.f32.mrb[41].mxu0  ;;  %1006 = vmatmul.mubr.bf16.gmra.mrb[36].mxu1 %v752_v1 }
 0x19e   :  { %v507_v5 = vpop.f32.mrb[42].mxu0  ;;  %1015 = vmatprep.mubr.bf16.mxu1 %v1569_v0 }
 0x19f   :  { %v508_v6 = vadd.f32 %v1660_v9, %v507_v5  ;;  %v509_v7 = vpop.f32.mrb[43].mxu0  ;;  %v699_v8 = vmax.f32 %v505_v3, 0.0 }
 0x1a1   :  { %v700_v10 = vmax.f32 %v508_v6, 0.0 }
 0x1a3   :  { %v753_v11 = vpack.c.bf16 %v700_v10, %v699_v8 }
 0x1a4   :  { %v512_v12 = vpop.f32.mrb[44].mxu0 }
 0x1a5   :  { %v513_v13 = vadd.f32 %v1660_v9, %v512_v12  ;;  %v514_v14 = vpop.f32.mrb[45].mxu0  ;;  %1016 = vmatmul.mubr.bf16.gmra.mrb[40].mxu1 %v753_v11 }
 0x1a6   :  { %v515_v15 = vpop.f32.mrb[46].mxu0  ;;  %1025 = vmatprep.mubr.bf16.mxu1 %v1569_v0 }
 0x1a7   :  { %v516_v16 = vadd.f32 %v1660_v9, %v515_v15  ;;  %v517_v17 = vpop.f32.mrb[47].mxu0  ;;  %v701_v18 = vmax.f32 %v513_v13, 0.0 }
 0x1a9   :  { %v702_v19 = vmax.f32 %v516_v16, 0.0 }
 0x1ab   :  { %v754_v20 = vpack.c.bf16 %v702_v19, %v701_v18 }
 0x1ac   :  { %v520_v21 = vpop.f32.mrb[48].mxu0 }
 0x1ad   :  { %v521_v22 = vadd.f32 %v1660_v9, %v520_v21  ;;  %v522_v23 = vpop.f32.mrb[49].mxu0  ;;  %1026 = vmatmul.mubr.bf16.gmra.mrb[44].mxu1 %v754_v20 }
 0x1ae   :  { %v523_v24 = vpop.f32.mrb[50].mxu0  ;;  %1035 = vmatprep.mubr.bf16.mxu1 %v1569_v0 }
 0x1af   :  { %v524_v25 = vadd.f32 %v1660_v9, %v523_v24  ;;  %v525_v26 = vpop.f32.mrb[51].mxu0  ;;  %v703_v27 = vmax.f32 %v521_v22, 0.0 }
 0x1b1   :  { %v704_v28 = vmax.f32 %v524_v25, 0.0 }
 0x1b3   :  { %v755_v29 = vpack.c.bf16 %v704_v28, %v703_v27 }
 0x1b4   :  { %v528_v30 = vpop.f32.mrb[52].mxu0 }
 0x1b5   :  { %v529_v31 = vadd.f32 %v1660_v9, %v528_v30  ;;  %v530_v32 = vpop.f32.mrb[53].mxu0  ;;  %1036 = vmatmul.mubr.bf16.gmra.mrb[48].mxu1 %v755_v29 }
 0x1b6   :  { %v531_v33 = vpop.f32.mrb[54].mxu0  ;;  %1045 = vmatprep.mubr.bf16.mxu1 %v1569_v0 }
 0x1b7   :  { %v532_v34 = vadd.f32 %v1660_v9, %v531_v33  ;;  %v533_v35 = vpop.f32.mrb[55].mxu0  ;;  %v705_v36 = vmax.f32 %v529_v31, 0.0 }
 0x1b9   :  { %v706_v37 = vmax.f32 %v532_v34, 0.0 }
 0x1bb   :  { %v756_v38 = vpack.c.bf16 %v706_v37, %v705_v36 }
 0x1bc   :  { %v536_v39 = vpop.f32.mrb[56].mxu0 }
 0x1bd   :  { %v537_v40 = vadd.f32 %v1660_v9, %v536_v39  ;;  %v538_v41 = vpop.f32.mrb[57].mxu0  ;;  %1046 = vmatmul.mubr.bf16.gmra.mrb[52].mxu1 %v756_v38 }
 0x1be   :  { %v539_v42 = vpop.f32.mrb[58].mxu0  ;;  %1055 = vmatprep.mubr.bf16.mxu1 %v1569_v0 }
 0x1bf   :  { %v540_v43 = vadd.f32 %v1660_v9, %v539_v42  ;;  %v541_v44 = vpop.f32.mrb[59].mxu0  ;;  %v707_v45 = vmax.f32 %v537_v40, 0.0 }
 0x1c1   :  { %v708_v46 = vmax.f32 %v540_v43, 0.0 }
 0x1c3   :  { %v757_v47 = vpack.c.bf16 %v708_v46, %v707_v45 }
 0x1c4   :  { %v544_v48 = vpop.f32.mrb[60].mxu0 }
 0x1c5   :  { %v545_v49 = vadd.f32 %v1660_v9, %v544_v48  ;;  %v546_v50 = vpop.f32.mrb[61].mxu0  ;;  %1056 = vmatmul.mubr.bf16.gmra.mrb[56].mxu1 %v757_v47 }
 0x1c6   :  { %v547_v51 = vpop.f32.mrb[62].mxu0  ;;  %1065 = vmatprep.mubr.bf16.mxu1 %v1569_v0 }
 0x1c7   :  { %v548_v52 = vadd.f32 %v1660_v9, %v547_v51  ;;  %v549_v53 = vpop.f32.mrb[63].mxu0  ;;  %v709_v54 = vmax.f32 %v545_v49, 0.0 }
 0x1c9   :  { %v710_v55 = vmax.f32 %v548_v52, 0.0 }
 0x1cb   :  { %v758_v56 = vpack.c.bf16 %v710_v55, %v709_v54 }
 0x1cc   :  { %v552_v57 = vpop.f32.mrb[64].mxu0 }
 0x1cd   :  { %v553_v58 = vadd.f32 %v1660_v9, %v552_v57  ;;  %v554_v59 = vpop.f32.mrb[65].mxu0  ;;  %1066 = vmatmul.mubr.bf16.gmra.mrb[60].mxu1 %v758_v56 }
 0x1ce   :  { %v555_v60 = vpop.f32.mrb[66].mxu0  ;;  %1075 = vmatprep.mubr.bf16.mxu1 %v1569_v0 }
 0x1cf   :  { %v556_v61 = vadd.f32 %v1660_v9, %v555_v60  ;;  %v557_v62 = vpop.f32.mrb[67].mxu0  ;;  %v711_v63 = vmax.f32 %v553_v58, 0.0 }
 0x1d1   :  { %v712_v1 = vmax.f32 %v556_v61, 0.0 }
 0x1d3   :  { %v759_v2 = vpack.c.bf16 %v712_v1, %v711_v63 }
 0x1d4   :  { %v560_v3 = vpop.f32.mrb[68].mxu0 }
 0x1d5   :  { %v561_v4 = vadd.f32 %v1660_v9, %v560_v3  ;;  %v562_v5 = vpop.f32.mrb[69].mxu0  ;;  %1076 = vmatmul.mubr.bf16.gmra.mrb[64].mxu1 %v759_v2 }
 0x1d6   :  { %v563_v6 = vpop.f32.mrb[70].mxu0  ;;  %1085 = vmatprep.mubr.bf16.mxu1 %v1569_v0 }
 0x1d7   :  { %v564_v7 = vadd.f32 %v1660_v9, %v563_v6  ;;  %v565_v8 = vpop.f32.mrb[71].mxu0  ;;  %v713_v10 = vmax.f32 %v561_v4, 0.0 }
 0x1d9   :  { %v714_v11 = vmax.f32 %v564_v7, 0.0 }
 0x1db   :  { %v760_v12 = vpack.c.bf16 %v714_v11, %v713_v10 }
 0x1dc   :  { %v568_v13 = vpop.f32.mrb[72].mxu0 }
 0x1dd   :  { %v569_v14 = vadd.f32 %v1660_v9, %v568_v13  ;;  %v570_v15 = vpop.f32.mrb[73].mxu0  ;;  %1086 = vmatmul.mubr.bf16.gmra.mrb[68].mxu1 %v760_v12 }
 0x1de   :  { %v571_v16 = vpop.f32.mrb[74].mxu0  ;;  %1095 = vmatprep.mubr.bf16.mxu1 %v1569_v0 }
 0x1df   :  { %v572_v17 = vadd.f32 %v1660_v9, %v571_v16  ;;  %v573_v18 = vpop.f32.mrb[75].mxu0  ;;  %v715_v19 = vmax.f32 %v569_v14, 0.0 }
 0x1e1   :  { %v716_v20 = vmax.f32 %v572_v17, 0.0 }
 0x1e3   :  { %v761_v21 = vpack.c.bf16 %v716_v20, %v715_v19 }
 0x1e4   :  { %v576_v22 = vpop.f32.mrb[76].mxu0 }
 0x1e5   :  { %v577_v23 = vadd.f32 %v1660_v9, %v576_v22  ;;  %v578_v24 = vpop.f32.mrb[77].mxu0  ;;  %1096 = vmatmul.mubr.bf16.gmra.mrb[72].mxu1 %v761_v21  ;;  %v793_v22 = vlaneseq }
 0x1e6   :  { %v579_v25 = vpop.f32.mrb[78].mxu0  ;;  %1105 = vmatprep.mubr.bf16.mxu1 %v1569_v0 }
 0x1e7   :  { %v580_v26 = vadd.f32 %v1660_v9, %v579_v25  ;;  %v581_v27 = vpop.f32.mrb[79].mxu0  ;;  %v717_v28 = vmax.f32 %v577_v23, 0.0 }
 0x1e8   :  { %v794_v27 = vshrl.u32 %v793_v22, 7 }
 0x1e9   :  { %v718_v29 = vmax.f32 %v580_v26, 0.0 }
 0x1eb   :  { %v762_v30 = vpack.c.bf16 %v718_v29, %v717_v28 }
 0x1ec   :  { %v584_v31 = vpop.f32.mrb[80].mxu0 }
 0x1ed   :  { %v585_v32 = vadd.f32 %v1660_v9, %v584_v31  ;;  %v586_v33 = vpop.f32.mrb[81].mxu0  ;;  %1106 = vmatmul.mubr.bf16.gmra.mrb[76].mxu1 %v762_v30 }
 0x1ee   :  { %v587_v34 = vpop.f32.mrb[82].mxu0  ;;  %1115 = vmatprep.mubr.bf16.mxu1 %v1569_v0  ;;  %v795_v33 = vsub.s32 0, %v794_v27 }
 0x1ef   :  { %v588_v35 = vadd.f32 %v1660_v9, %v587_v34  ;;  %v589_v36 = vpop.f32.mrb[83].mxu0  ;;  %v719_v37 = vmax.f32 %v585_v32, 0.0  ;;  %v791_v34 = vld [vmem:[%s1911_s4] sm:$0x3]  ;;  %s1570_s4 = smov [#allocation8]  }
 0x1f0   :  { %s1369_s10 = sshll.u32 %s1570_s4, 4  ;;  %s1370_s10 = int_to_ptr.vmem [resolvable:$true] %s1369_s10 }
 0x1f1   :  { %v720_v38 = vmax.f32 %v588_v35, 0.0  ;;  %v799_v35 = vsub.s32 1, %v794_v27  ;;  %s1532_s11 = scalar_lea.vmem %s1370_s10, 16384  ;;  %p1537_p11 = scmp.lt.s32.totalorder %s1370_s10, %s1370_s10 }
 0x1f2   :  { %p1533_p10 = scmp.ne.s32.totalorder %s1370_s10, %s1532_s11  ;;  %p1538_p12 = scmp.lt.s32.totalorder %s1532_s11, %s1532_s11 }
 0x1f3   :  { %v763_v39 = vpack.c.bf16 %v720_v38, %v719_v37 }
 0x1f4   :  { %v592_v40 = vpop.f32.mrb[84].mxu0  ;;  %p1539_p13 = por %p1538_p12, %p1537_p11 }
 0x1f5   :  { %v593_v41 = vadd.f32 %v1660_v9, %v592_v40  ;;  %v594_v42 = vpop.f32.mrb[85].mxu0  ;;  %1116 = vmatmul.mubr.bf16.gmra.mrb[80].mxu1 %v763_v39  ;;  %v1746_v40 = vrot.slane %v791_v34, %v795_v33 }
 0x1f6   :  { %v595_v43 = vpop.f32.mrb[86].mxu0  ;;  %1125 = vmatprep.mubr.bf16.mxu1 %v1569_v0  ;;  %v1748_v42 = vrot.slane %v791_v34, %v799_v35  ;;  %p1540_p0 = pnand %p1539_p13, %p1533_p10 }
 0x1f7   :  { %v596_v44 = vadd.f32 %v1660_v9, %v595_v43  ;;  %v597_v45 = vpop.f32.mrb[87].mxu0  ;;  %v721_v46 = vmax.f32 %v593_v41, 0.0 }
 0x1f9   :  { %v722_v47 = vmax.f32 %v596_v44, 0.0 }
 0x1fb   :  { %v764_v48 = vpack.c.bf16 %v722_v47, %v721_v46 }
 0x1fc   :  { %v600_v49 = vpop.f32.mrb[88].mxu0 }
 0x1fd   :  { %v601_v50 = vadd.f32 %v1660_v9, %v600_v49  ;;  %v602_v51 = vpop.f32.mrb[89].mxu0  ;;  %1126 = vmatmul.mubr.bf16.gmra.mrb[84].mxu1 %v764_v48 }
 0x1fe   :  { %v603_v52 = vpop.f32.mrb[90].mxu0  ;;  %1135 = vmatprep.mubr.bf16.mxu1 %v1569_v0 }
 0x1ff   :  { %v604_v53 = vadd.f32 %v1660_v9, %v603_v52  ;;  %v605_v54 = vpop.f32.mrb[91].mxu0  ;;  %v723_v55 = vmax.f32 %v601_v50, 0.0 }
 0x201   :  { %v724_v56 = vmax.f32 %v604_v53, 0.0 }
 0x203   :  { %v765_v57 = vpack.c.bf16 %v724_v56, %v723_v55 }
 0x204   :  { %v608_v58 = vpop.f32.mrb[92].mxu0 }
 0x205   :  { %v609_v59 = vadd.f32 %v1660_v9, %v608_v58  ;;  %v610_v60 = vpop.f32.mrb[93].mxu0  ;;  %1136 = vmatmul.mubr.bf16.gmra.mrb[88].mxu1 %v765_v57 }
 0x206   :  { %v611_v61 = vpop.f32.mrb[94].mxu0  ;;  %1145 = vmatprep.mubr.bf16.mxu1 %v1569_v0 }
 0x207   :  { %v612_v62 = vadd.f32 %v1660_v9, %v611_v61  ;;  %v613_v63 = vpop.f32.mrb[95].mxu0  ;;  %v725_v1 = vmax.f32 %v609_v59, 0.0 }
 0x209   :  { %v726_v2 = vmax.f32 %v612_v62, 0.0 }
 0x20b   :  { %v766_v3 = vpack.c.bf16 %v726_v2, %v725_v1 }
 0x20c   :  { %v616_v4 = vpop.f32.mrb[96].mxu0 }
 0x20d   :  { %v617_v5 = vadd.f32 %v1660_v9, %v616_v4  ;;  %v618_v6 = vpop.f32.mrb[97].mxu0  ;;  %1146 = vmatmul.mubr.bf16.gmra.mrb[92].mxu1 %v766_v3 }
 0x20e   :  { %v619_v7 = vpop.f32.mrb[98].mxu0  ;;  %1155 = vmatprep.mubr.bf16.mxu1 %v1569_v0 }
 0x20f   :  { %v620_v8 = vadd.f32 %v1660_v9, %v619_v7  ;;  %v621_v10 = vpop.f32.mrb[99].mxu0  ;;  %v727_v11 = vmax.f32 %v617_v5, 0.0 }
 0x211   :  { %v728_v12 = vmax.f32 %v620_v8, 0.0 }
 0x213   :  { %v767_v13 = vpack.c.bf16 %v728_v12, %v727_v11 }
 0x214   :  { %v624_v14 = vpop.f32.mrb[100].mxu0 }
 0x215   :  { %v625_v15 = vadd.f32 %v1660_v9, %v624_v14  ;;  %v626_v16 = vpop.f32.mrb[101].mxu0  ;;  %1156 = vmatmul.mubr.bf16.gmra.mrb[96].mxu1 %v767_v13 }
 0x216   :  { %v627_v17 = vpop.f32.mrb[102].mxu0  ;;  %1165 = vmatprep.mubr.bf16.mxu1 %v1569_v0 }
 0x217   :  { %v628_v18 = vadd.f32 %v1660_v9, %v627_v17  ;;  %v629_v19 = vpop.f32.mrb[103].mxu0  ;;  %v729_v20 = vmax.f32 %v625_v15, 0.0 }
 0x219   :  { %v730_v21 = vmax.f32 %v628_v18, 0.0 }
 0x21b   :  { %v768_v23 = vpack.c.bf16 %v730_v21, %v729_v20 }
 0x21c   :  { %v632_v24 = vpop.f32.mrb[104].mxu0 }
 0x21d   :  { %v633_v25 = vadd.f32 %v1660_v9, %v632_v24  ;;  %v634_v26 = vpop.f32.mrb[105].mxu0  ;;  %1166 = vmatmul.mubr.bf16.gmra.mrb[100].mxu1 %v768_v23 }
 0x21e   :  { %v635_v28 = vpop.f32.mrb[106].mxu0  ;;  %1175 = vmatprep.mubr.bf16.mxu1 %v1569_v0 }
 0x21f   :  { %v636_v29 = vadd.f32 %v1660_v9, %v635_v28  ;;  %v637_v30 = vpop.f32.mrb[107].mxu0  ;;  %v731_v31 = vmax.f32 %v633_v25, 0.0 }
 0x221   :  { %v732_v32 = vmax.f32 %v636_v29, 0.0 }
 0x223   :  { %v769_v36 = vpack.c.bf16 %v732_v32, %v731_v31 }
 0x224   :  { %v640_v37 = vpop.f32.mrb[108].mxu0 }
 0x225   :  { %v641_v38 = vadd.f32 %v1660_v9, %v640_v37  ;;  %v642_v39 = vpop.f32.mrb[109].mxu0  ;;  %1176 = vmatmul.mubr.bf16.gmra.mrb[104].mxu1 %v769_v36 }
 0x226   :  { %v643_v41 = vpop.f32.mrb[110].mxu0  ;;  %1185 = vmatprep.mubr.bf16.mxu1 %v1569_v0 }
 0x227   :  { %v644_v43 = vadd.f32 %v1660_v9, %v643_v41  ;;  %v645_v44 = vpop.f32.mrb[111].mxu0  ;;  %v733_v46 = vmax.f32 %v641_v38, 0.0 }
 0x228   :  { %v917_v45 = vpop.f32.mrb[0].mxu1 }
 0x229   :  { %v734_v47 = vmax.f32 %v644_v43, 0.0  ;;  %v918_v48 = vadd.f32 %v917_v45, %v1746_v40  ;;  %v919_v49 = vpop.f32.mrb[1].mxu1 }
 0x22a   :  { %v920_v50 = vadd.f32 %v919_v49, %v1748_v42  ;;  %v921_v51 = vpop.f32.mrb[2].mxu1 }
 0x22b   :  { %v770_v52 = vpack.c.bf16 %v734_v47, %v733_v46  ;;  %1236 = vst [vmem:[#allocation8] sm:$0xff] %v918_v48  ;;  %v922_v53 = vadd.f32 %v921_v51, %v1746_v40  ;;  %v923_v54 = vpop.f32.mrb[3].mxu1 }
 0x22c   :  { %1237 = vst [vmem:[#allocation8 + $0x8] sm:$0xff] %v920_v50  ;;  %v924_v55 = vadd.f32 %v923_v54, %v1748_v42  ;;  %v648_v56 = vpop.f32.mrb[112].mxu0 }
 0x22d   :  { %1238 = vst [vmem:[#allocation8 + $0x10] sm:$0xff] %v922_v53  ;;  %v649_v57 = vadd.f32 %v1660_v9, %v648_v56  ;;  %v650_v58 = vpop.f32.mrb[113].mxu0  ;;  %1186 = vmatmul.mubr.bf16.gmra.mrb[108].mxu1 %v770_v52 }
 0x22e   :  { %1239 = vst [vmem:[#allocation8 + $0x18] sm:$0xff] %v924_v55  ;;  %v651_v59 = vpop.f32.mrb[114].mxu0  ;;  %1195 = vmatprep.mubr.bf16.mxu1 %v1569_v0 }
 0x22f   :  { %v652_v60 = vadd.f32 %v1660_v9, %v651_v59  ;;  %v653_v61 = vpop.f32.mrb[115].mxu0  ;;  %v735_v63 = vmax.f32 %v649_v57, 0.0 }
 0x230   :  { %v927_v62 = vpop.f32.mrb[4].mxu1 }
 0x231   :  { %v736_v1 = vmax.f32 %v652_v60, 0.0  ;;  %v928_v2 = vadd.f32 %v927_v62, %v1746_v40  ;;  %v929_v3 = vpop.f32.mrb[5].mxu1 }
 0x232   :  { %v930_v4 = vadd.f32 %v929_v3, %v1748_v42  ;;  %v931_v5 = vpop.f32.mrb[6].mxu1 }
 0x233   :  { %v771_v6 = vpack.c.bf16 %v736_v1, %v735_v63  ;;  %1240 = vst [vmem:[#allocation8 + $0x20] sm:$0xff] %v928_v2  ;;  %v932_v7 = vadd.f32 %v931_v5, %v1746_v40  ;;  %v933_v8 = vpop.f32.mrb[7].mxu1 }
 0x234   :  { %1241 = vst [vmem:[#allocation8 + $0x28] sm:$0xff] %v930_v4  ;;  %v934_v10 = vadd.f32 %v933_v8, %v1748_v42  ;;  %v656_v11 = vpop.f32.mrb[116].mxu0 }
 0x235   :  { %1242 = vst [vmem:[#allocation8 + $0x30] sm:$0xff] %v932_v7  ;;  %v657_v12 = vadd.f32 %v1660_v9, %v656_v11  ;;  %v658_v13 = vpop.f32.mrb[117].mxu0  ;;  %1196 = vmatmul.mubr.bf16.gmra.mrb[112].mxu1 %v771_v6 }
 0x236   :  { %1243 = vst [vmem:[#allocation8 + $0x38] sm:$0xff] %v934_v10  ;;  %v659_v14 = vpop.f32.mrb[118].mxu0  ;;  %1205 = vmatprep.mubr.bf16.mxu1 %v1569_v0 }
 0x237   :  { %v660_v15 = vadd.f32 %v1660_v9, %v659_v14  ;;  %v661_v16 = vpop.f32.mrb[119].mxu0  ;;  %v737_v18 = vmax.f32 %v657_v12, 0.0 }
 0x238   :  { %v937_v17 = vpop.f32.mrb[8].mxu1 }
 0x239   :  { %v738_v19 = vmax.f32 %v660_v15, 0.0  ;;  %v938_v20 = vadd.f32 %v937_v17, %v1746_v40  ;;  %v939_v21 = vpop.f32.mrb[9].mxu1 }
 0x23a   :  { %v940_v22 = vadd.f32 %v939_v21, %v1748_v42  ;;  %v941_v23 = vpop.f32.mrb[10].mxu1 }
 0x23b   :  { %v772_v24 = vpack.c.bf16 %v738_v19, %v737_v18  ;;  %1244 = vst [vmem:[#allocation8 + $0x40] sm:$0xff] %v938_v20  ;;  %v942_v25 = vadd.f32 %v941_v23, %v1746_v40  ;;  %v943_v26 = vpop.f32.mrb[11].mxu1 }
 0x23c   :  { %1245 = vst [vmem:[#allocation8 + $0x48] sm:$0xff] %v940_v22  ;;  %v944_v27 = vadd.f32 %v943_v26, %v1748_v42  ;;  %v664_v28 = vpop.f32.mrb[120].mxu0 }
 0x23d   :  { %1246 = vst [vmem:[#allocation8 + $0x50] sm:$0xff] %v942_v25  ;;  %v665_v29 = vadd.f32 %v1660_v9, %v664_v28  ;;  %v666_v30 = vpop.f32.mrb[121].mxu0  ;;  %1206 = vmatmul.mubr.bf16.gmra.mrb[116].mxu1 %v772_v24 }
 0x23e   :  { %1247 = vst [vmem:[#allocation8 + $0x58] sm:$0xff] %v944_v27  ;;  %v667_v31 = vpop.f32.mrb[122].mxu0  ;;  %1215 = vmatprep.mubr.bf16.mxu1 %v1569_v0 }
 0x23f   :  { %v668_v32 = vadd.f32 %v1660_v9, %v667_v31  ;;  %v669_v33 = vpop.f32.mrb[123].mxu0  ;;  %v739_v35 = vmax.f32 %v665_v29, 0.0 }
 0x240   :  { %v947_v34 = vpop.f32.mrb[12].mxu1 }
 0x241   :  { %v740_v36 = vmax.f32 %v668_v32, 0.0  ;;  %v948_v37 = vadd.f32 %v947_v34, %v1746_v40  ;;  %v949_v38 = vpop.f32.mrb[13].mxu1 }
 0x242   :  { %v950_v39 = vadd.f32 %v949_v38, %v1748_v42  ;;  %v951_v41 = vpop.f32.mrb[14].mxu1 }
 0x243   :  { %v773_v43 = vpack.c.bf16 %v740_v36, %v739_v35  ;;  %1248 = vst [vmem:[#allocation8 + $0x60] sm:$0xff] %v948_v37  ;;  %v952_v44 = vadd.f32 %v951_v41, %v1746_v40  ;;  %v953_v45 = vpop.f32.mrb[15].mxu1 }
 0x244   :  { %1249 = vst [vmem:[#allocation8 + $0x68] sm:$0xff] %v950_v39  ;;  %v954_v46 = vadd.f32 %v953_v45, %v1748_v42  ;;  %v672_v47 = vpop.f32.mrb[124].mxu0 }
 0x245   :  { %1250 = vst [vmem:[#allocation8 + $0x70] sm:$0xff] %v952_v44  ;;  %v673_v48 = vadd.f32 %v1660_v9, %v672_v47  ;;  %v674_v49 = vpop.f32.mrb[125].mxu0  ;;  %1216 = vmatmul.mubr.bf16.gmra.mrb[120].mxu1 %v773_v43 }
 0x246   :  { %1251 = vst [vmem:[#allocation8 + $0x78] sm:$0xff] %v954_v46  ;;  %v675_v50 = vpop.f32.mrb[126].mxu0  ;;  %1225 = vmatprep.mubr.bf16.mxu1 %v1569_v0 }
 0x247   :  { %v676_v51 = vadd.f32 %v1660_v9, %v675_v50  ;;  %v677_v52 = vpop.f32.mrb[127].mxu0  ;;  %v741_v54 = vmax.f32 %v673_v48, 0.0 }
 0x248   :  { %v957_v53 = vpop.f32.mrb[16].mxu1 }
 0x249   :  { %v742_v55 = vmax.f32 %v676_v51, 0.0  ;;  %v958_v56 = vadd.f32 %v957_v53, %v1746_v40  ;;  %v959_v57 = vpop.f32.mrb[17].mxu1 }
 0x24a   :  { %v960_v58 = vadd.f32 %v959_v57, %v1748_v42  ;;  %v961_v59 = vpop.f32.mrb[18].mxu1 }
 0x24b   :  { %v774_v60 = vpack.c.bf16 %v742_v55, %v741_v54  ;;  %1252 = vst [vmem:[#allocation8 + $0x80] sm:$0xff] %v958_v56  ;;  %v962_v61 = vadd.f32 %v961_v59, %v1746_v40  ;;  %v963_v62 = vpop.f32.mrb[19].mxu1 }
 0x24c   :  { %1253 = vst [vmem:[#allocation8 + $0x88] sm:$0xff] %v960_v58  ;;  %v964_v0 = vadd.f32 %v963_v62, %v1748_v42 }
 0x24d   :  { %1254 = vst [vmem:[#allocation8 + $0x90] sm:$0xff] %v962_v61  ;;  %1226 = vmatmul.mubr.bf16.gmra.mrb[124].mxu1 %v774_v60 }
 0x24e   :  { %1255 = vst [vmem:[#allocation8 + $0x98] sm:$0xff] %v964_v0 }
 0x250   :  { %v967_v9 = vpop.f32.mrb[20].mxu1 }
 0x251   :  { %v968_v63 = vadd.f32 %v967_v9, %v1746_v40  ;;  %v969_v1 = vpop.f32.mrb[21].mxu1 }
 0x252   :  { %v970_v2 = vadd.f32 %v969_v1, %v1748_v42  ;;  %v971_v3 = vpop.f32.mrb[22].mxu1 }
 0x253   :  { %1256 = vst [vmem:[#allocation8 + $0xa0] sm:$0xff] %v968_v63  ;;  %v972_v4 = vadd.f32 %v971_v3, %v1746_v40  ;;  %v973_v5 = vpop.f32.mrb[23].mxu1 }
 0x254   :  { %1257 = vst [vmem:[#allocation8 + $0xa8] sm:$0xff] %v970_v2  ;;  %v974_v6 = vadd.f32 %v973_v5, %v1748_v42 }
 0x255   :  { %1258 = vst [vmem:[#allocation8 + $0xb0] sm:$0xff] %v972_v4 }
 0x256   :  { %1259 = vst [vmem:[#allocation8 + $0xb8] sm:$0xff] %v974_v6 }
 0x258   :  { %v977_v7 = vpop.f32.mrb[24].mxu1 }
 0x259   :  { %v978_v8 = vadd.f32 %v977_v7, %v1746_v40  ;;  %v979_v10 = vpop.f32.mrb[25].mxu1 }
 0x25a   :  { %v980_v11 = vadd.f32 %v979_v10, %v1748_v42  ;;  %v981_v12 = vpop.f32.mrb[26].mxu1 }
 0x25b   :  { %1260 = vst [vmem:[#allocation8 + $0xc0] sm:$0xff] %v978_v8  ;;  %v982_v13 = vadd.f32 %v981_v12, %v1746_v40  ;;  %v983_v14 = vpop.f32.mrb[27].mxu1 }
 0x25c   :  { %1261 = vst [vmem:[#allocation8 + $0xc8] sm:$0xff] %v980_v11  ;;  %v984_v15 = vadd.f32 %v983_v14, %v1748_v42 }
 0x25d   :  { %1262 = vst [vmem:[#allocation8 + $0xd0] sm:$0xff] %v982_v13 }
 0x25e   :  { %1263 = vst [vmem:[#allocation8 + $0xd8] sm:$0xff] %v984_v15 }
 0x260   :  { %v987_v16 = vpop.f32.mrb[28].mxu1 }
 0x261   :  { %v988_v17 = vadd.f32 %v987_v16, %v1746_v40  ;;  %v989_v18 = vpop.f32.mrb[29].mxu1 }
 0x262   :  { %v990_v19 = vadd.f32 %v989_v18, %v1748_v42  ;;  %v991_v20 = vpop.f32.mrb[30].mxu1 }
 0x263   :  { %1264 = vst [vmem:[#allocation8 + $0xe0] sm:$0xff] %v988_v17  ;;  %v992_v21 = vadd.f32 %v991_v20, %v1746_v40  ;;  %v993_v22 = vpop.f32.mrb[31].mxu1 }
 0x264   :  { %1265 = vst [vmem:[#allocation8 + $0xe8] sm:$0xff] %v990_v19  ;;  %v994_v23 = vadd.f32 %v993_v22, %v1748_v42 }
 0x265   :  { %1266 = vst [vmem:[#allocation8 + $0xf0] sm:$0xff] %v992_v21 }
 0x266   :  { %1267 = vst [vmem:[#allocation8 + $0xf8] sm:$0xff] %v994_v23 }
 0x268   :  { %v997_v24 = vpop.f32.mrb[32].mxu1 }
 0x269   :  { %v998_v25 = vadd.f32 %v997_v24, %v1746_v40  ;;  %v999_v26 = vpop.f32.mrb[33].mxu1 }
 0x26a   :  { %v1000_v27 = vadd.f32 %v999_v26, %v1748_v42  ;;  %v1001_v28 = vpop.f32.mrb[34].mxu1 }
 0x26b   :  { %1268 = vst [vmem:[#allocation8 + $0x100] sm:$0xff] %v998_v25  ;;  %v1002_v29 = vadd.f32 %v1001_v28, %v1746_v40  ;;  %v1003_v30 = vpop.f32.mrb[35].mxu1 }
 0x26c   :  { %1269 = vst [vmem:[#allocation8 + $0x108] sm:$0xff] %v1000_v27  ;;  %v1004_v31 = vadd.f32 %v1003_v30, %v1748_v42 }
 0x26d   :  { %1270 = vst [vmem:[#allocation8 + $0x110] sm:$0xff] %v1002_v29 }
 0x26e   :  { %1271 = vst [vmem:[#allocation8 + $0x118] sm:$0xff] %v1004_v31 }
 0x270   :  { %v1007_v32 = vpop.f32.mrb[36].mxu1 }
 0x271   :  { %v1008_v33 = vadd.f32 %v1007_v32, %v1746_v40  ;;  %v1009_v34 = vpop.f32.mrb[37].mxu1 }
 0x272   :  { %v1010_v35 = vadd.f32 %v1009_v34, %v1748_v42  ;;  %v1011_v36 = vpop.f32.mrb[38].mxu1 }
 0x273   :  { %1272 = vst [vmem:[#allocation8 + $0x120] sm:$0xff] %v1008_v33  ;;  %v1012_v37 = vadd.f32 %v1011_v36, %v1746_v40  ;;  %v1013_v38 = vpop.f32.mrb[39].mxu1 }
 0x274   :  { %1273 = vst [vmem:[#allocation8 + $0x128] sm:$0xff] %v1010_v35  ;;  %v1014_v39 = vadd.f32 %v1013_v38, %v1748_v42 }
 0x275   :  { %1274 = vst [vmem:[#allocation8 + $0x130] sm:$0xff] %v1012_v37 }
 0x276   :  { %1275 = vst [vmem:[#allocation8 + $0x138] sm:$0xff] %v1014_v39 }
 0x278   :  { %v1017_v41 = vpop.f32.mrb[40].mxu1 }
 0x279   :  { %v1018_v43 = vadd.f32 %v1017_v41, %v1746_v40  ;;  %v1019_v44 = vpop.f32.mrb[41].mxu1 }
 0x27a   :  { %v1020_v45 = vadd.f32 %v1019_v44, %v1748_v42  ;;  %v1021_v46 = vpop.f32.mrb[42].mxu1 }
 0x27b   :  { %1276 = vst [vmem:[#allocation8 + $0x140] sm:$0xff] %v1018_v43  ;;  %v1022_v47 = vadd.f32 %v1021_v46, %v1746_v40  ;;  %v1023_v48 = vpop.f32.mrb[43].mxu1 }
 0x27c   :  { %1277 = vst [vmem:[#allocation8 + $0x148] sm:$0xff] %v1020_v45  ;;  %v1024_v49 = vadd.f32 %v1023_v48, %v1748_v42 }
 0x27d   :  { %1278 = vst [vmem:[#allocation8 + $0x150] sm:$0xff] %v1022_v47 }
 0x27e   :  { %1279 = vst [vmem:[#allocation8 + $0x158] sm:$0xff] %v1024_v49 }
 0x280   :  { %v1027_v50 = vpop.f32.mrb[44].mxu1 }
 0x281   :  { %v1028_v51 = vadd.f32 %v1027_v50, %v1746_v40  ;;  %v1029_v52 = vpop.f32.mrb[45].mxu1 }
 0x282   :  { %v1030_v53 = vadd.f32 %v1029_v52, %v1748_v42  ;;  %v1031_v54 = vpop.f32.mrb[46].mxu1 }
 0x283   :  { %1280 = vst [vmem:[#allocation8 + $0x160] sm:$0xff] %v1028_v51  ;;  %v1032_v55 = vadd.f32 %v1031_v54, %v1746_v40  ;;  %v1033_v56 = vpop.f32.mrb[47].mxu1 }
 0x284   :  { %1281 = vst [vmem:[#allocation8 + $0x168] sm:$0xff] %v1030_v53  ;;  %v1034_v57 = vadd.f32 %v1033_v56, %v1748_v42 }
 0x285   :  { %1282 = vst [vmem:[#allocation8 + $0x170] sm:$0xff] %v1032_v55 }
 0x286   :  { %1283 = vst [vmem:[#allocation8 + $0x178] sm:$0xff] %v1034_v57 }
 0x288   :  { %v1037_v58 = vpop.f32.mrb[48].mxu1 }
 0x289   :  { %v1038_v59 = vadd.f32 %v1037_v58, %v1746_v40  ;;  %v1039_v60 = vpop.f32.mrb[49].mxu1 }
 0x28a   :  { %v1040_v61 = vadd.f32 %v1039_v60, %v1748_v42  ;;  %v1041_v62 = vpop.f32.mrb[50].mxu1 }
 0x28b   :  { %1284 = vst [vmem:[#allocation8 + $0x180] sm:$0xff] %v1038_v59  ;;  %v1042_v0 = vadd.f32 %v1041_v62, %v1746_v40  ;;  %v1043_v9 = vpop.f32.mrb[51].mxu1 }
 0x28c   :  { %1285 = vst [vmem:[#allocation8 + $0x188] sm:$0xff] %v1040_v61  ;;  %v1044_v63 = vadd.f32 %v1043_v9, %v1748_v42 }
 0x28d   :  { %1286 = vst [vmem:[#allocation8 + $0x190] sm:$0xff] %v1042_v0 }
 0x28e   :  { %1287 = vst [vmem:[#allocation8 + $0x198] sm:$0xff] %v1044_v63 }
 0x290   :  { %v1047_v1 = vpop.f32.mrb[52].mxu1 }
 0x291   :  { %v1048_v2 = vadd.f32 %v1047_v1, %v1746_v40  ;;  %v1049_v3 = vpop.f32.mrb[53].mxu1 }
 0x292   :  { %v1050_v4 = vadd.f32 %v1049_v3, %v1748_v42  ;;  %v1051_v5 = vpop.f32.mrb[54].mxu1 }
 0x293   :  { %1288 = vst [vmem:[#allocation8 + $0x1a0] sm:$0xff] %v1048_v2  ;;  %v1052_v6 = vadd.f32 %v1051_v5, %v1746_v40  ;;  %v1053_v7 = vpop.f32.mrb[55].mxu1 }
 0x294   :  { %1289 = vst [vmem:[#allocation8 + $0x1a8] sm:$0xff] %v1050_v4  ;;  %v1054_v8 = vadd.f32 %v1053_v7, %v1748_v42 }
 0x295   :  { %1290 = vst [vmem:[#allocation8 + $0x1b0] sm:$0xff] %v1052_v6 }
 0x296   :  { %1291 = vst [vmem:[#allocation8 + $0x1b8] sm:$0xff] %v1054_v8 }
 0x298   :  { %v1057_v10 = vpop.f32.mrb[56].mxu1 }
 0x299   :  { %v1058_v11 = vadd.f32 %v1057_v10, %v1746_v40  ;;  %v1059_v12 = vpop.f32.mrb[57].mxu1 }
 0x29a   :  { %v1060_v13 = vadd.f32 %v1059_v12, %v1748_v42  ;;  %v1061_v14 = vpop.f32.mrb[58].mxu1 }
 0x29b   :  { %1292 = vst [vmem:[#allocation8 + $0x1c0] sm:$0xff] %v1058_v11  ;;  %v1062_v15 = vadd.f32 %v1061_v14, %v1746_v40  ;;  %v1063_v16 = vpop.f32.mrb[59].mxu1 }
 0x29c   :  { %1293 = vst [vmem:[#allocation8 + $0x1c8] sm:$0xff] %v1060_v13  ;;  %v1064_v17 = vadd.f32 %v1063_v16, %v1748_v42 }
 0x29d   :  { %1294 = vst [vmem:[#allocation8 + $0x1d0] sm:$0xff] %v1062_v15 }
 0x29e   :  { %1295 = vst [vmem:[#allocation8 + $0x1d8] sm:$0xff] %v1064_v17 }
 0x2a0   :  { %v1067_v18 = vpop.f32.mrb[60].mxu1 }
 0x2a1   :  { %v1068_v19 = vadd.f32 %v1067_v18, %v1746_v40  ;;  %v1069_v20 = vpop.f32.mrb[61].mxu1 }
 0x2a2   :  { %v1070_v21 = vadd.f32 %v1069_v20, %v1748_v42  ;;  %v1071_v22 = vpop.f32.mrb[62].mxu1 }
 0x2a3   :  { %1296 = vst [vmem:[#allocation8 + $0x1e0] sm:$0xff] %v1068_v19  ;;  %v1072_v23 = vadd.f32 %v1071_v22, %v1746_v40  ;;  %v1073_v24 = vpop.f32.mrb[63].mxu1 }
 0x2a4   :  { %1297 = vst [vmem:[#allocation8 + $0x1e8] sm:$0xff] %v1070_v21  ;;  %v1074_v25 = vadd.f32 %v1073_v24, %v1748_v42 }
 0x2a5   :  { %1298 = vst [vmem:[#allocation8 + $0x1f0] sm:$0xff] %v1072_v23 }
 0x2a6   :  { %1299 = vst [vmem:[#allocation8 + $0x1f8] sm:$0xff] %v1074_v25 }
 0x2a8   :  { %v1077_v26 = vpop.f32.mrb[64].mxu1 }
 0x2a9   :  { %v1078_v27 = vadd.f32 %v1077_v26, %v1746_v40  ;;  %v1079_v28 = vpop.f32.mrb[65].mxu1 }
 0x2aa   :  { %v1080_v29 = vadd.f32 %v1079_v28, %v1748_v42  ;;  %v1081_v30 = vpop.f32.mrb[66].mxu1 }
 0x2ab   :  { %1300 = vst [vmem:[#allocation8 + $0x200] sm:$0xff] %v1078_v27  ;;  %v1082_v31 = vadd.f32 %v1081_v30, %v1746_v40  ;;  %v1083_v32 = vpop.f32.mrb[67].mxu1 }
 0x2ac   :  { %1301 = vst [vmem:[#allocation8 + $0x208] sm:$0xff] %v1080_v29  ;;  %v1084_v33 = vadd.f32 %v1083_v32, %v1748_v42 }
 0x2ad   :  { %1302 = vst [vmem:[#allocation8 + $0x210] sm:$0xff] %v1082_v31 }
 0x2ae   :  { %1303 = vst [vmem:[#allocation8 + $0x218] sm:$0xff] %v1084_v33 }
 0x2b0   :  { %v1087_v34 = vpop.f32.mrb[68].mxu1 }
 0x2b1   :  { %v1088_v35 = vadd.f32 %v1087_v34, %v1746_v40  ;;  %v1089_v36 = vpop.f32.mrb[69].mxu1 }
 0x2b2   :  { %v1090_v37 = vadd.f32 %v1089_v36, %v1748_v42  ;;  %v1091_v38 = vpop.f32.mrb[70].mxu1 }
 0x2b3   :  { %1304 = vst [vmem:[#allocation8 + $0x220] sm:$0xff] %v1088_v35  ;;  %v1092_v39 = vadd.f32 %v1091_v38, %v1746_v40  ;;  %v1093_v41 = vpop.f32.mrb[71].mxu1 }
 0x2b4   :  { %1305 = vst [vmem:[#allocation8 + $0x228] sm:$0xff] %v1090_v37  ;;  %v1094_v43 = vadd.f32 %v1093_v41, %v1748_v42 }
 0x2b5   :  { %1306 = vst [vmem:[#allocation8 + $0x230] sm:$0xff] %v1092_v39 }
 0x2b6   :  { %1307 = vst [vmem:[#allocation8 + $0x238] sm:$0xff] %v1094_v43 }
 0x2b8   :  { %v1097_v44 = vpop.f32.mrb[72].mxu1 }
 0x2b9   :  { %v1098_v45 = vadd.f32 %v1097_v44, %v1746_v40  ;;  %v1099_v46 = vpop.f32.mrb[73].mxu1 }
 0x2ba   :  { %v1100_v47 = vadd.f32 %v1099_v46, %v1748_v42  ;;  %v1101_v48 = vpop.f32.mrb[74].mxu1 }
 0x2bb   :  { %1308 = vst [vmem:[#allocation8 + $0x240] sm:$0xff] %v1098_v45  ;;  %v1102_v49 = vadd.f32 %v1101_v48, %v1746_v40  ;;  %v1103_v50 = vpop.f32.mrb[75].mxu1 }
 0x2bc   :  { %1309 = vst [vmem:[#allocation8 + $0x248] sm:$0xff] %v1100_v47  ;;  %v1104_v51 = vadd.f32 %v1103_v50, %v1748_v42 }
 0x2bd   :  { %1310 = vst [vmem:[#allocation8 + $0x250] sm:$0xff] %v1102_v49 }
 0x2be   :  { %1311 = vst [vmem:[#allocation8 + $0x258] sm:$0xff] %v1104_v51 }
 0x2c0   :  { %v1107_v52 = vpop.f32.mrb[76].mxu1 }
 0x2c1   :  { %v1108_v53 = vadd.f32 %v1107_v52, %v1746_v40  ;;  %v1109_v54 = vpop.f32.mrb[77].mxu1 }
 0x2c2   :  { %v1110_v55 = vadd.f32 %v1109_v54, %v1748_v42  ;;  %v1111_v56 = vpop.f32.mrb[78].mxu1 }
 0x2c3   :  { %1312 = vst [vmem:[#allocation8 + $0x260] sm:$0xff] %v1108_v53  ;;  %v1112_v57 = vadd.f32 %v1111_v56, %v1746_v40  ;;  %v1113_v58 = vpop.f32.mrb[79].mxu1 }
 0x2c4   :  { %1313 = vst [vmem:[#allocation8 + $0x268] sm:$0xff] %v1110_v55  ;;  %v1114_v59 = vadd.f32 %v1113_v58, %v1748_v42 }
 0x2c5   :  { %1314 = vst [vmem:[#allocation8 + $0x270] sm:$0xff] %v1112_v57 }
 0x2c6   :  { %1315 = vst [vmem:[#allocation8 + $0x278] sm:$0xff] %v1114_v59 }
 0x2c8   :  { %v1117_v60 = vpop.f32.mrb[80].mxu1 }
 0x2c9   :  { %v1118_v61 = vadd.f32 %v1117_v60, %v1746_v40  ;;  %v1119_v62 = vpop.f32.mrb[81].mxu1 }
 0x2ca   :  { %v1120_v0 = vadd.f32 %v1119_v62, %v1748_v42  ;;  %v1121_v9 = vpop.f32.mrb[82].mxu1 }
 0x2cb   :  { %1316 = vst [vmem:[#allocation8 + $0x280] sm:$0xff] %v1118_v61  ;;  %v1122_v63 = vadd.f32 %v1121_v9, %v1746_v40  ;;  %v1123_v1 = vpop.f32.mrb[83].mxu1 }
 0x2cc   :  { %1317 = vst [vmem:[#allocation8 + $0x288] sm:$0xff] %v1120_v0  ;;  %v1124_v2 = vadd.f32 %v1123_v1, %v1748_v42 }
 0x2cd   :  { %1318 = vst [vmem:[#allocation8 + $0x290] sm:$0xff] %v1122_v63 }
 0x2ce   :  { %1319 = vst [vmem:[#allocation8 + $0x298] sm:$0xff] %v1124_v2 }
 0x2d0   :  { %v1127_v3 = vpop.f32.mrb[84].mxu1 }
 0x2d1   :  { %v1128_v4 = vadd.f32 %v1127_v3, %v1746_v40  ;;  %v1129_v5 = vpop.f32.mrb[85].mxu1 }
 0x2d2   :  { %v1130_v6 = vadd.f32 %v1129_v5, %v1748_v42  ;;  %v1131_v7 = vpop.f32.mrb[86].mxu1 }
 0x2d3   :  { %1320 = vst [vmem:[#allocation8 + $0x2a0] sm:$0xff] %v1128_v4  ;;  %v1132_v8 = vadd.f32 %v1131_v7, %v1746_v40  ;;  %v1133_v10 = vpop.f32.mrb[87].mxu1 }
 0x2d4   :  { %1321 = vst [vmem:[#allocation8 + $0x2a8] sm:$0xff] %v1130_v6  ;;  %v1134_v11 = vadd.f32 %v1133_v10, %v1748_v42 }
 0x2d5   :  { %1322 = vst [vmem:[#allocation8 + $0x2b0] sm:$0xff] %v1132_v8 }
 0x2d6   :  { %1323 = vst [vmem:[#allocation8 + $0x2b8] sm:$0xff] %v1134_v11 }
 0x2d8   :  { %v1137_v12 = vpop.f32.mrb[88].mxu1 }
 0x2d9   :  { %v1138_v13 = vadd.f32 %v1137_v12, %v1746_v40  ;;  %v1139_v14 = vpop.f32.mrb[89].mxu1 }
 0x2da   :  { %v1140_v15 = vadd.f32 %v1139_v14, %v1748_v42  ;;  %v1141_v16 = vpop.f32.mrb[90].mxu1 }
 0x2db   :  { %1324 = vst [vmem:[#allocation8 + $0x2c0] sm:$0xff] %v1138_v13  ;;  %v1142_v17 = vadd.f32 %v1141_v16, %v1746_v40  ;;  %v1143_v18 = vpop.f32.mrb[91].mxu1 }
 0x2dc   :  { %1325 = vst [vmem:[#allocation8 + $0x2c8] sm:$0xff] %v1140_v15  ;;  %v1144_v19 = vadd.f32 %v1143_v18, %v1748_v42 }
 0x2dd   :  { %1326 = vst [vmem:[#allocation8 + $0x2d0] sm:$0xff] %v1142_v17 }
 0x2de   :  { %1327 = vst [vmem:[#allocation8 + $0x2d8] sm:$0xff] %v1144_v19 }
 0x2e0   :  { %v1147_v20 = vpop.f32.mrb[92].mxu1 }
 0x2e1   :  { %v1148_v21 = vadd.f32 %v1147_v20, %v1746_v40  ;;  %v1149_v22 = vpop.f32.mrb[93].mxu1 }
 0x2e2   :  { %v1150_v23 = vadd.f32 %v1149_v22, %v1748_v42  ;;  %v1151_v24 = vpop.f32.mrb[94].mxu1 }
 0x2e3   :  { %1328 = vst [vmem:[#allocation8 + $0x2e0] sm:$0xff] %v1148_v21  ;;  %v1152_v25 = vadd.f32 %v1151_v24, %v1746_v40  ;;  %v1153_v26 = vpop.f32.mrb[95].mxu1 }
 0x2e4   :  { %1329 = vst [vmem:[#allocation8 + $0x2e8] sm:$0xff] %v1150_v23  ;;  %v1154_v27 = vadd.f32 %v1153_v26, %v1748_v42 }
 0x2e5   :  { %1330 = vst [vmem:[#allocation8 + $0x2f0] sm:$0xff] %v1152_v25 }
 0x2e6   :  { %1331 = vst [vmem:[#allocation8 + $0x2f8] sm:$0xff] %v1154_v27 }
 0x2e8   :  { %v1157_v28 = vpop.f32.mrb[96].mxu1 }
 0x2e9   :  { %v1158_v29 = vadd.f32 %v1157_v28, %v1746_v40  ;;  %v1159_v30 = vpop.f32.mrb[97].mxu1 }
 0x2ea   :  { %v1160_v31 = vadd.f32 %v1159_v30, %v1748_v42  ;;  %v1161_v32 = vpop.f32.mrb[98].mxu1 }
 0x2eb   :  { %1332 = vst [vmem:[#allocation8 + $0x300] sm:$0xff] %v1158_v29  ;;  %v1162_v33 = vadd.f32 %v1161_v32, %v1746_v40  ;;  %v1163_v34 = vpop.f32.mrb[99].mxu1 }
 0x2ec   :  { %1333 = vst [vmem:[#allocation8 + $0x308] sm:$0xff] %v1160_v31  ;;  %v1164_v35 = vadd.f32 %v1163_v34, %v1748_v42 }
 0x2ed   :  { %1334 = vst [vmem:[#allocation8 + $0x310] sm:$0xff] %v1162_v33 }
 0x2ee   :  { %1335 = vst [vmem:[#allocation8 + $0x318] sm:$0xff] %v1164_v35 }
 0x2f0   :  { %v1167_v36 = vpop.f32.mrb[100].mxu1 }
 0x2f1   :  { %v1168_v37 = vadd.f32 %v1167_v36, %v1746_v40  ;;  %v1169_v38 = vpop.f32.mrb[101].mxu1 }
 0x2f2   :  { %v1170_v39 = vadd.f32 %v1169_v38, %v1748_v42  ;;  %v1171_v41 = vpop.f32.mrb[102].mxu1 }
 0x2f3   :  { %1336 = vst [vmem:[#allocation8 + $0x320] sm:$0xff] %v1168_v37  ;;  %v1172_v43 = vadd.f32 %v1171_v41, %v1746_v40  ;;  %v1173_v44 = vpop.f32.mrb[103].mxu1 }
 0x2f4   :  { %1337 = vst [vmem:[#allocation8 + $0x328] sm:$0xff] %v1170_v39  ;;  %v1174_v45 = vadd.f32 %v1173_v44, %v1748_v42 }
 0x2f5   :  { %1338 = vst [vmem:[#allocation8 + $0x330] sm:$0xff] %v1172_v43 }
 0x2f6   :  { %1339 = vst [vmem:[#allocation8 + $0x338] sm:$0xff] %v1174_v45 }
 0x2f8   :  { %v1177_v46 = vpop.f32.mrb[104].mxu1 }
 0x2f9   :  { %v1178_v47 = vadd.f32 %v1177_v46, %v1746_v40  ;;  %v1179_v48 = vpop.f32.mrb[105].mxu1 }
 0x2fa   :  { %v1180_v49 = vadd.f32 %v1179_v48, %v1748_v42  ;;  %v1181_v50 = vpop.f32.mrb[106].mxu1 }
 0x2fb   :  { %1340 = vst [vmem:[#allocation8 + $0x340] sm:$0xff] %v1178_v47  ;;  %v1182_v51 = vadd.f32 %v1181_v50, %v1746_v40  ;;  %v1183_v52 = vpop.f32.mrb[107].mxu1 }
 0x2fc   :  { %1341 = vst [vmem:[#allocation8 + $0x348] sm:$0xff] %v1180_v49  ;;  %v1184_v53 = vadd.f32 %v1183_v52, %v1748_v42 }
 0x2fd   :  { %1342 = vst [vmem:[#allocation8 + $0x350] sm:$0xff] %v1182_v51 }
 0x2fe   :  { %1343 = vst [vmem:[#allocation8 + $0x358] sm:$0xff] %v1184_v53 }
 0x300   :  { %v1187_v54 = vpop.f32.mrb[108].mxu1 }
 0x301   :  { %v1188_v55 = vadd.f32 %v1187_v54, %v1746_v40  ;;  %v1189_v56 = vpop.f32.mrb[109].mxu1 }
 0x302   :  { %v1190_v57 = vadd.f32 %v1189_v56, %v1748_v42  ;;  %v1191_v58 = vpop.f32.mrb[110].mxu1 }
 0x303   :  { %1344 = vst [vmem:[#allocation8 + $0x360] sm:$0xff] %v1188_v55  ;;  %v1192_v59 = vadd.f32 %v1191_v58, %v1746_v40  ;;  %v1193_v60 = vpop.f32.mrb[111].mxu1 }
 0x304   :  { %1345 = vst [vmem:[#allocation8 + $0x368] sm:$0xff] %v1190_v57  ;;  %v1194_v61 = vadd.f32 %v1193_v60, %v1748_v42 }
 0x305   :  { %1346 = vst [vmem:[#allocation8 + $0x370] sm:$0xff] %v1192_v59 }
 0x306   :  { %1347 = vst [vmem:[#allocation8 + $0x378] sm:$0xff] %v1194_v61 }
 0x308   :  { %v1197_v62 = vpop.f32.mrb[112].mxu1 }
 0x309   :  { %v1198_v0 = vadd.f32 %v1197_v62, %v1746_v40  ;;  %v1199_v9 = vpop.f32.mrb[113].mxu1 }
 0x30a   :  { %v1200_v63 = vadd.f32 %v1199_v9, %v1748_v42  ;;  %v1201_v1 = vpop.f32.mrb[114].mxu1 }
 0x30b   :  { %1348 = vst [vmem:[#allocation8 + $0x380] sm:$0xff] %v1198_v0  ;;  %v1202_v2 = vadd.f32 %v1201_v1, %v1746_v40  ;;  %v1203_v3 = vpop.f32.mrb[115].mxu1 }
 0x30c   :  { %1349 = vst [vmem:[#allocation8 + $0x388] sm:$0xff] %v1200_v63  ;;  %v1204_v4 = vadd.f32 %v1203_v3, %v1748_v42 }
 0x30d   :  { %1350 = vst [vmem:[#allocation8 + $0x390] sm:$0xff] %v1202_v2 }
 0x30e   :  { %1351 = vst [vmem:[#allocation8 + $0x398] sm:$0xff] %v1204_v4 }
 0x310   :  { %v1207_v5 = vpop.f32.mrb[116].mxu1 }
 0x311   :  { %v1208_v6 = vadd.f32 %v1207_v5, %v1746_v40  ;;  %v1209_v7 = vpop.f32.mrb[117].mxu1 }
 0x312   :  { %v1210_v8 = vadd.f32 %v1209_v7, %v1748_v42  ;;  %v1211_v10 = vpop.f32.mrb[118].mxu1 }
 0x313   :  { %1352 = vst [vmem:[#allocation8 + $0x3a0] sm:$0xff] %v1208_v6  ;;  %v1212_v11 = vadd.f32 %v1211_v10, %v1746_v40  ;;  %v1213_v12 = vpop.f32.mrb[119].mxu1 }
 0x314   :  { %1353 = vst [vmem:[#allocation8 + $0x3a8] sm:$0xff] %v1210_v8  ;;  %v1214_v13 = vadd.f32 %v1213_v12, %v1748_v42 }
 0x315   :  { %1354 = vst [vmem:[#allocation8 + $0x3b0] sm:$0xff] %v1212_v11 }
 0x316   :  { %1355 = vst [vmem:[#allocation8 + $0x3b8] sm:$0xff] %v1214_v13 }
 0x318   :  { %v1217_v14 = vpop.f32.mrb[120].mxu1 }
 0x319   :  { %v1218_v15 = vadd.f32 %v1217_v14, %v1746_v40  ;;  %v1219_v16 = vpop.f32.mrb[121].mxu1 }
 0x31a   :  { %v1220_v17 = vadd.f32 %v1219_v16, %v1748_v42  ;;  %v1221_v18 = vpop.f32.mrb[122].mxu1 }
 0x31b   :  { %1356 = vst [vmem:[#allocation8 + $0x3c0] sm:$0xff] %v1218_v15  ;;  %v1222_v19 = vadd.f32 %v1221_v18, %v1746_v40  ;;  %v1223_v20 = vpop.f32.mrb[123].mxu1 }
 0x31c   :  { %1357 = vst [vmem:[#allocation8 + $0x3c8] sm:$0xff] %v1220_v17  ;;  %v1224_v21 = vadd.f32 %v1223_v20, %v1748_v42 }
 0x31d   :  { %1358 = vst [vmem:[#allocation8 + $0x3d0] sm:$0xff] %v1222_v19 }
 0x31e   :  { %1359 = vst [vmem:[#allocation8 + $0x3d8] sm:$0xff] %v1224_v21 }
 0x320   :  { %v1227_v22 = vpop.f32.mrb[124].mxu1 }
 0x321   :  { %v1228_v23 = vadd.f32 %v1227_v22, %v1746_v40  ;;  %v1229_v24 = vpop.f32.mrb[125].mxu1 }
 0x322   :  { %v1230_v25 = vadd.f32 %v1229_v24, %v1748_v42  ;;  %v1231_v26 = vpop.f32.mrb[126].mxu1 }
 0x323   :  { %1360 = vst [vmem:[#allocation8 + $0x3e0] sm:$0xff] %v1228_v23  ;;  %v1232_v27 = vadd.f32 %v1231_v26, %v1746_v40  ;;  %v1233_v28 = vpop.f32.mrb[127].mxu1 }
 0x324   :  { %1361 = vst [vmem:[#allocation8 + $0x3e8] sm:$0xff] %v1230_v25  ;;  %v1234_v29 = vadd.f32 %v1233_v28, %v1748_v42 }
 0x325   :  { %1362 = vst [vmem:[#allocation8 + $0x3f0] sm:$0xff] %v1232_v27 }
 0x326   :  { %1363 = vst [vmem:[#allocation8 + $0x3f8] sm:$0xff] %v1234_v29 }
 0x327   :  { %1543 = shalt.err (!%p1540_p0)
}
 0x328   :  { %s1544_s14 = scalar_lea.hbm %s1912_s5, 16384 }
 0x329   :  { %p1545_p1 = scmp.ne.s32.totalorder %s1912_s5, %s1544_s14  ;;  %p1548_p2 = scmp.lt.u32.totalorder %s1544_s14, %s1912_s5 }
 0x32b   :  { %p1550_p3 = pnand %p1548_p2, %p1545_p1 }
 0x32d   :  { %1553 = shalt.err (!%p1550_p3)
}
 0x32e   :  { %1375 = dma.vmem_to_hbm [thread:$0]  %s1370_s10, 16384, %s1912_s5, [#allocation4], %s1564_s1, %s1564_s1, %s1565_s17  }
 0x32f   :  { %1558 = dma.done.wait [#allocation4], 16384  }
 0x330   :  { %1559 = vsyncadd [#allocation4], 4294950912 }
 0x331   :  { %1379 = vsyncpa [#allocation3], 1 }
 0x332   :  { %1380 = vsyncpa [#allocation6], 1 }
 0x333   :  { %1381 = vsyncpa [#allocation4], 1 }

</bundles_post_ra>
